<compile_context>
chip_gen: v7x
topology: tpu7x:2x2x1
jax: 0.10.0
libtpu: 0.0.40
codegen_flags: <defaults>
</compile_context>

<pallas_src>
import functools

import jax
import jax.numpy as jnp
import numpy as np
from jax.experimental import pallas as pl
from jax.experimental.pallas import tpu as pltpu


def lstm_kernel(x_ref, h0_ref, c0_ref, wx_ref, wh_ref, b_ref,
                out_ref, c_last_ref,
                h_scr, c_scr, xg_scr,
                *, seq_len, t_chunk, batch, hidden_p, unroll):
    """One grid step = (batch chunk j, time chunk i) -> `t_chunk` timesteps.

    x_ref      : (Tc*Bb, Din)   input chunk (time-major, batch inner), compute dtype
    h0/c0      : (Bb, Hp)       initial state for this batch chunk (used at i == 0)
    wx_ref     : (Din, 4*Hp)    input->gates weights  (resident, compute dtype)
    wh_ref     : (Hp, 4*Hp)     hidden->gates weights (resident, compute dtype)
    b_ref      : (1, 4*Hp)      bias (f32)
    out_ref    : (Tc*Bb, Hp)    per-timestep hidden outputs for this chunk (f32)
    c_last_ref : (Bb, Hp)       final cell state (resident; written on last chunk)
    h_scr/c_scr: (Bb, Hp)       recurrent state carried across time chunks (f32)
    xg_scr     : (Tc*Bb, 4*Hp)  hoisted x-projection + bias for the chunk (f32)
    """
    t_id = pl.program_id(1)
    n_t = pl.num_programs(1)
    Hp = hidden_p

    # Initialise the recurrent state at the start of each batch chunk's sweep.
    @pl.when(t_id == 0)
    def _():
        h_scr[...] = h0_ref[...]
        c_scr[...] = c0_ref[...]

    # Hoisted chunk-level x projection: one MXU matmul for all Tc timesteps
    # (bias folded in).  MXU operands may be bf16; accumulation is f32.
    xg_scr[...] = (
        jnp.dot(x_ref[...], wx_ref[...], preferred_element_type=jnp.float32)
        + b_ref[...])

    wh = wh_ref[...]                       # hoist the resident weight load

    def make_step(masked):
        def step(tt, carry):
            h, c = carry
            row = pl.multiple_of(tt * batch, 8)
            xg_t = xg_scr[pl.ds(row, batch), :]                   # (Bb, 4*Hp)
            # Exactly one small matmul on the serialized recurrent path.
            gates = xg_t + jnp.dot(h.astype(wh.dtype), wh,
                                   preferred_element_type=jnp.float32)

            # Lane-aligned (multiple-of-128) gate slices.
            forget_g = jax.nn.sigmoid(gates[:, :Hp])
            input_g = jax.nn.sigmoid(gates[:, Hp:2 * Hp])
            candidate = jnp.tanh(gates[:, 2 * Hp:3 * Hp])
            output_g = jax.nn.sigmoid(gates[:, 3 * Hp:])

            c_new = forget_g * c + input_g * candidate
            h_new = output_g * jnp.tanh(c_new)

            if masked:
                # Only emitted for the last time chunk when T % Tc != 0.
                valid = (t_id * t_chunk + tt) < seq_len
                c_new = jnp.where(valid, c_new, c)
                h_new = jnp.where(valid, h_new, h)

            out_ref[pl.ds(row, batch), :] = h_new                 # full-lane store
            return h_new, c_new
        return step

    carry0 = (h_scr[...], c_scr[...])
    is_last = t_id == n_t - 1

    def run_chunk(masked, c_last_mode):
        h_fin, c_fin = jax.lax.fori_loop(
            0, t_chunk, make_step(masked), carry0, unroll=unroll)
        h_scr[...] = h_fin
        c_scr[...] = c_fin
        if c_last_mode == "always":
            c_last_ref[...] = c_fin
        elif c_last_mode == "if_last":
            @pl.when(is_last)
            def _():
                c_last_ref[...] = c_fin
        # "never": no c_last store on this path.

    if (seq_len % t_chunk) == 0:
        # No ragged tail: single unmasked path; c_last written only on the
        # final time chunk.
        run_chunk(masked=False, c_last_mode="if_last")
    else:
        # Unmasked fast path for all but the last chunk; masked path (and the
        # c_last store) only on the ragged final chunk.
        @pl.when(t_id < n_t - 1)
        def _():
            run_chunk(masked=False, c_last_mode="never")

        @pl.when(is_last)
        def _():
            run_chunk(masked=True, c_last_mode="always")


def lstm_forward(x, hidden_state, cell_state, weights, bias, *,
                 t_chunk=16, batch_block=256, compute_dtype=jnp.bfloat16):
    """Pallas equivalent of LSTMCell.forward (layernorm=False).

    x:            (T, B, input_dim) float32
    hidden_state: (1, B, hidden_dim) float32
    cell_state:   (1, B, hidden_dim) float32
    weights:      (input_dim + hidden_dim, 4*hidden_dim) float32
    bias:         (4*hidden_dim,) float32
    compute_dtype: dtype fed to the MXU (x / Wx / Wh / h operands); gate math
                   and the c/h state are always f32.
    returns: (output (T,B,H), (hidden_state (1,B,H), cell_state (1,B,H)))
    """
    T, B, Din = x.shape
    H = hidden_state.shape[-1]
    assert weights.shape == (Din + H, 4 * H)
    f32 = jnp.float32

    # --- static layout derivation --------------------------------------------
    Hp = ((H + 127) // 128) * 128             # lane-pad the hidden dim
    Bb = min(((B + 7) // 8) * 8,              # sublane-pad batch, cap block rows
             max(8, ((batch_block + 7) // 8) * 8))
    n_bc = -(-B // Bb)                        # batch chunks -> 'parallel' axis
    Bp = n_bc * Bb

    itemsize_c = jnp.dtype(compute_dtype).itemsize
    # Conservative VMEM budget: stays under v7x's 32 MiB default scoped limit.
    vmem_budget = 24 * 1024 * 1024
    fixed_vmem = 2 * (Din + Hp + 1) * 4 * Hp * itemsize_c      # Wx/Wh/bias blocks
    fixed_vmem += 8 * Bb * Hp * 4                              # h0/c0/c_last/h_scr/c_scr

    def _chunk_vmem(tc):  # double-buffered x & out chunks + xg scratch
        return tc * Bb * (2 * Din * itemsize_c + 2 * Hp * 4 + 4 * Hp * 4)

    Tc = max(1, min(t_chunk, T))
    while Tc > 1 and fixed_vmem + _chunk_vmem(Tc) > vmem_budget:
        Tc = (Tc + 1) // 2
    if T % Tc != 0:
        # Prefer a chunk size that divides T so no masked tail path is emitted.
        for cand in range(Tc, 0, -1):
            if T % cand == 0:
                if cand >= max(1, Tc // 4):
                    Tc = cand
                break
    T_pad = -(-T // Tc) * Tc
    n_tc = T_pad // Tc

    # Partial unroll if the (h, c) carry would not fit the 64-vreg file.
    state_vregs = 2 * (Bb // 8) * (Hp // 128)
    unroll = Tc if state_vregs <= 8 else min(Tc, 4)

    # --- parameter / state layout (one-time, cheap) ---------------------------
    Wx = weights[:Din].astype(compute_dtype)
    Wh = weights[Din:].astype(compute_dtype)
    if Hp == H:
        Wx_p, Wh_p = Wx, Wh
        b_p = bias.reshape(1, 4 * H).astype(f32)
    else:
        Wx_p = jnp.zeros((Din, 4 * Hp), compute_dtype)
        Wh_p = jnp.zeros((Hp, 4 * Hp), compute_dtype)
        b_p = jnp.zeros((1, 4 * Hp), f32)
        for g in range(4):
            Wx_p = Wx_p.at[:, g * Hp:g * Hp + H].set(Wx[:, g * H:(g + 1) * H])
            Wh_p = Wh_p.at[:H, g * Hp:g * Hp + H].set(Wh[:, g * H:(g + 1) * H])
            b_p = b_p.at[:, g * Hp:g * Hp + H].set(bias[g * H:(g + 1) * H])

    if (Bp, Hp) == (B, H):
        h0 = hidden_state[0].reshape(n_bc, Bb, Hp).astype(f32)
        c0 = cell_state[0].reshape(n_bc, Bb, Hp).astype(f32)
    else:
        h0 = jnp.zeros((Bp, Hp), f32).at[:B, :H].set(hidden_state[0]).reshape(n_bc, Bb, Hp)
        c0 = jnp.zeros((Bp, Hp), f32).at[:B, :H].set(cell_state[0]).reshape(n_bc, Bb, Hp)

    x_c = x.astype(compute_dtype)
    if (T_pad, Bp) == (T, B):
        x_p = x_c
    else:
        x_p = jnp.zeros((T_pad, Bp, Din), compute_dtype).at[:T, :B, :].set(x_c)
    if n_bc == 1:
        x_slab = x_p.reshape(1, T_pad * Bp, Din)       # free (metadata) reshape
    else:
        # TODO(synk): at production sizes feed x batch-major upstream to avoid
        #             this extra HBM transpose pass.
        x_slab = (x_p.reshape(T_pad, n_bc, Bb, Din)
                  .transpose(1, 0, 2, 3)
                  .reshape(n_bc, T_pad * Bb, Din))

    kernel = functools.partial(
        lstm_kernel, seq_len=T, t_chunk=Tc, batch=Bb, hidden_p=Hp, unroll=unroll)

    grid_spec = pltpu.PrefetchScalarGridSpec(
        num_scalar_prefetch=0,
        grid=(n_bc, n_tc),                              # (parallel batch, sequential time)
        in_specs=[
            pl.BlockSpec((None, Tc * Bb, Din), lambda j, i: (j, i, 0)),  # x chunk
            pl.BlockSpec((None, Bb, Hp), lambda j, i: (j, 0, 0)),        # h0
            pl.BlockSpec((None, Bb, Hp), lambda j, i: (j, 0, 0)),        # c0
            pl.BlockSpec((Din, 4 * Hp), lambda j, i: (0, 0)),            # Wx (resident)
            pl.BlockSpec((Hp, 4 * Hp), lambda j, i: (0, 0)),             # Wh (resident)
            pl.BlockSpec((1, 4 * Hp), lambda j, i: (0, 0)),              # bias
        ],
        out_specs=[
            pl.BlockSpec((None, Tc * Bb, Hp), lambda j, i: (j, i, 0)),   # hidden outputs
            pl.BlockSpec((None, Bb, Hp), lambda j, i: (j, 0, 0)),        # final cell state
        ],
        scratch_shapes=[
            pltpu.VMEM((Bb, Hp), f32),              # h state across time chunks
            pltpu.VMEM((Bb, Hp), f32),              # c state across time chunks
            pltpu.VMEM((Tc * Bb, 4 * Hp), f32),     # hoisted x projection
        ],
    )

    out_slab, c_slab = pl.pallas_call(
        kernel,
        out_shape=(
            jax.ShapeDtypeStruct((n_bc, T_pad * Bb, Hp), f32),
            jax.ShapeDtypeStruct((n_bc, Bb, Hp), f32),
        ),
        grid_spec=grid_spec,
        compiler_params=pltpu.CompilerParams(
            # batch chunks are independent (2 TCs on v7x); time is a recurrence
            dimension_semantics=("parallel", "arbitrary")),
    )(x_slab, h0, c0, Wx_p, Wh_p, b_p)

    out3 = out_slab.reshape(n_bc, T_pad, Bb, Hp)
    if n_bc == 1:
        out_full = out3[0]
    else:
        out_full = out3.transpose(1, 0, 2, 3).reshape(T_pad, Bp, Hp)
    out = out_full[:T, :B, :H]
    h_last = out[T - 1:T]                    # final hidden state == last output
    c_last = c_slab.reshape(Bp, Hp)[None, :B, :H]
    return out, (h_last, c_last)


def lstm_reference(x, h, c, weights, bias):
    """Pure-JAX reference mirroring the PyTorch forward loop."""
    H = h.shape[-1]
    outs = []
    for t in range(x.shape[0]):
        xh = jnp.concatenate([x[t:t + 1], h], axis=2)          # (1, B, Din+H)
        gates = jnp.matmul(xh, weights) + bias                  # (1, B, 4H)
        f = jax.nn.sigmoid(gates[:, :, :H])
        i = jax.nn.sigmoid(gates[:, :, H:2 * H])
        g = jnp.tanh(gates[:, :, 2 * H:3 * H])
        o = jax.nn.sigmoid(gates[:, :, 3 * H:])
        c = f * c + i * g
        h = o * jnp.tanh(c)
        outs.append(h)
    return jnp.concatenate(outs, axis=0), (h, c)


if __name__ == "__main__":
    T, B = 8, 4
    input_dim, hidden_dim = 16, 32
    dim_size = input_dim + hidden_dim

    key = jax.random.PRNGKey(0)
    k_w, k_x, k_h, k_c = jax.random.split(key, 4)

    # Deterministic parameter init matching the module:
    # xavier_uniform_ for the 2-D weight, zeros_ for the bias.
    limit = float(np.sqrt(6.0 / (dim_size + 4 * hidden_dim)))
    weights = jax.random.uniform(
        k_w, (dim_size, 4 * hidden_dim), jnp.float32, minval=-limit, maxval=limit)
    bias = jnp.zeros((4 * hidden_dim,), jnp.float32)

    x = jax.random.normal(k_x, (T, B, input_dim), jnp.float32)
    h0 = jax.random.normal(k_h, (1, B, hidden_dim), jnp.float32)
    c0 = jax.random.normal(k_c, (1, B, hidden_dim), jnp.float32)

    ref_out, (ref_h, ref_c) = lstm_reference(x, h0, c0, weights, bias)

    # 1) f32 MXU path: must match the f32 reference to 1e-5.
    out, (h_last, c_last) = lstm_forward(
        x, h0, c0, weights, bias, compute_dtype=jnp.float32)
    jax.block_until_ready((out, h_last, c_last))
    np.testing.assert_allclose(np.asarray(out), np.asarray(ref_out), atol=1e-5, rtol=1e-5)
    np.testing.assert_allclose(np.asarray(h_last), np.asarray(ref_h), atol=1e-5, rtol=1e-5)
    np.testing.assert_allclose(np.asarray(c_last), np.asarray(ref_c), atol=1e-5, rtol=1e-5)

    # 2) production path: bf16 MXU operands, f32 accumulation/elementwise,
    #    smaller time chunk to exercise the multi-chunk state carry.
    out_bf, (h_bf, c_bf) = lstm_forward(x, h0, c0, weights, bias, t_chunk=4)
    jax.block_until_ready((out_bf, h_bf, c_bf))
    np.testing.assert_allclose(np.asarray(out_bf), np.asarray(ref_out), atol=5e-2, rtol=5e-2)
    np.testing.assert_allclose(np.asarray(h_bf), np.asarray(ref_h), atol=5e-2, rtol=5e-2)
    np.testing.assert_allclose(np.asarray(c_bf), np.asarray(ref_c), atol=5e-2, rtol=5e-2)

    print("KERNEL_OK")
</pallas_src>

<mosaic_0001>
module attributes {stable_mosaic.version = 11 : i64} {
  func.func @lstm_kernel(%arg0: i32, %arg1: i32, %arg2: memref<1x64x16xf32, #tpu.memory_space<vmem>>, %arg3: memref<1x8x128xf32, #tpu.memory_space<vmem>>, %arg4: memref<1x8x128xf32, #tpu.memory_space<vmem>>, %arg5: memref<16x512xf32, #tpu.memory_space<vmem>>, %arg6: memref<128x512xf32, #tpu.memory_space<vmem>>, %arg7: memref<1x512xf32, #tpu.memory_space<vmem>>, %arg8: memref<1x64x128xf32, #tpu.memory_space<vmem>>, %arg9: memref<1x8x128xf32, #tpu.memory_space<vmem>>, %arg10: memref<8x128xf32, #tpu.memory_space<vmem>>, %arg11: memref<8x128xf32, #tpu.memory_space<vmem>>, %arg12: memref<64x512xf32, #tpu.memory_space<vmem>>) attributes {dimension_semantics = [#tpu.dimension_semantics<parallel>, #tpu.dimension_semantics<arbitrary>], iteration_bounds = array<i64: 1, 1>, scalar_prefetch = 0 : i64, scratch_operands = 3 : i64, tpu.core_type = #tpu.core_type<tc>, window_params = [{transform_indices = @transform_0, window_bounds = array<i64: 1, 64, 16>}, {transform_indices = @transform_1, window_bounds = array<i64: 1, 8, 128>}, {transform_indices = @transform_2, window_bounds = array<i64: 1, 8, 128>}, {pipeline_mode = #tpu.pipeline_mode<synchronous>, transform_indices = @transform_3, window_bounds = array<i64: 16, 512>}, {pipeline_mode = #tpu.pipeline_mode<synchronous>, transform_indices = @transform_4, window_bounds = array<i64: 128, 512>}, {pipeline_mode = #tpu.pipeline_mode<synchronous>, transform_indices = @transform_5, window_bounds = array<i64: 1, 512>}, {transform_indices = @transform_6, window_bounds = array<i64: 1, 64, 128>}, {transform_indices = @transform_7, window_bounds = array<i64: 1, 8, 128>}]} {
    %c0_i32 = arith.constant 0 : i32
    %0 = arith.cmpi eq, %arg1, %c0_i32 : i32
    %1 = arith.extui %0 : i1 to i32
    %c0_i32_0 = arith.constant 0 : i32
    %2 = arith.cmpi ne, %1, %c0_i32_0 : i32
    scf.if %2 {
      %c0_86 = arith.constant 0 : index
      %c0_87 = arith.constant 0 : index
      %c0_88 = arith.constant 0 : index
      %299 = vector.load %arg3[%c0_86, %c0_87, %c0_88] : memref<1x8x128xf32, #tpu.memory_space<vmem>>, vector<1x8x128xf32>
      %300 = vector.shape_cast %299 : vector<1x8x128xf32> to vector<8x128xf32>
      %c0_89 = arith.constant 0 : index
      %c0_90 = arith.constant 0 : index
      %301 = vector.load %arg10[%c0_89, %c0_90] : memref<8x128xf32, #tpu.memory_space<vmem>>, vector<8x128xf32>
      tpu.vector_store %arg10[%c0_89, %c0_90], %300 {strides = array<i32>} : memref<8x128xf32, #tpu.memory_space<vmem>>, vector<8x128xf32>,
      %c0_91 = arith.constant 0 : index
      %c0_92 = arith.constant 0 : index
      %c0_93 = arith.constant 0 : index
      %302 = vector.load %arg4[%c0_91, %c0_92, %c0_93] : memref<1x8x128xf32, #tpu.memory_space<vmem>>, vector<1x8x128xf32>
      %303 = vector.shape_cast %302 : vector<1x8x128xf32> to vector<8x128xf32>
      %c0_94 = arith.constant 0 : index
      %c0_95 = arith.constant 0 : index
      %304 = vector.load %arg11[%c0_94, %c0_95] : memref<8x128xf32, #tpu.memory_space<vmem>>, vector<8x128xf32>
      tpu.vector_store %arg11[%c0_94, %c0_95], %303 {strides = array<i32>} : memref<8x128xf32, #tpu.memory_space<vmem>>, vector<8x128xf32>,
    } else {
    }
    %c0 = arith.constant 0 : index
    %c0_1 = arith.constant 0 : index
    %c0_2 = arith.constant 0 : index
    %3 = vector.load %arg2[%c0, %c0_1, %c0_2] : memref<1x64x16xf32, #tpu.memory_space<vmem>>, vector<1x64x16xf32>
    %4 = vector.shape_cast %3 : vector<1x64x16xf32> to vector<64x16xf32>
    %c0_3 = arith.constant 0 : index
    %c0_4 = arith.constant 0 : index
    %5 = vector.load %arg5[%c0_3, %c0_4] : memref<16x512xf32, #tpu.memory_space<vmem>>, vector<16x512xf32>
    %cst = arith.constant dense<0.000000e+00> : vector<64x512xf32>
    %6 = tpu.matmul %4, %5, %cst {dimension_numbers = #tpu.dot_dimension_numbers<[1], [0], [0], [1], [0, 0, 1, 1], [], []>} : vector<64x16xf32>, vector<16x512xf32>, vector<64x512xf32> -> vector<64x512xf32>
    %c0_5 = arith.constant 0 : index
    %c0_6 = arith.constant 0 : index
    %7 = vector.load %arg7[%c0_5, %c0_6] : memref<1x512xf32, #tpu.memory_space<vmem>>, vector<1x512xf32>
    %8 = vector.broadcast %7 : vector<1x512xf32> to vector<64x512xf32>
    %9 = arith.addf %6, %8 : vector<64x512xf32>
    %c0_7 = arith.constant 0 : index
    %c0_8 = arith.constant 0 : index
    %10 = vector.load %arg12[%c0_7, %c0_8] : memref<64x512xf32, #tpu.memory_space<vmem>>, vector<64x512xf32>
    tpu.vector_store %arg12[%c0_7, %c0_8], %9 {strides = array<i32>} : memref<64x512xf32, #tpu.memory_space<vmem>>, vector<64x512xf32>,
    %c0_9 = arith.constant 0 : index
    %c0_10 = arith.constant 0 : index
    %11 = vector.load %arg6[%c0_9, %c0_10] : memref<128x512xf32, #tpu.memory_space<vmem>>, vector<128x512xf32>
    %c0_11 = arith.constant 0 : index
    %c0_12 = arith.constant 0 : index
    %12 = vector.load %arg10[%c0_11, %c0_12] : memref<8x128xf32, #tpu.memory_space<vmem>>, vector<8x128xf32>
    %c0_13 = arith.constant 0 : index
    %c0_14 = arith.constant 0 : index
    %13 = vector.load %arg11[%c0_13, %c0_14] : memref<8x128xf32, #tpu.memory_space<vmem>>, vector<8x128xf32>
    %c0_i32_15 = arith.constant 0 : i32
    %14 = arith.cmpi eq, %arg1, %c0_i32_15 : i32
    %c0_i32_16 = arith.constant 0 : i32
    %c8_i32 = arith.constant 8 : i32
    %15 = arith.muli %c0_i32_16, %c8_i32 : i32
    %16 = tpu.assume_multiple %15, 8 : i32
    %17 = arith.index_cast %16 : i32 to index
    %c0_17 = arith.constant 0 : index
    %18 = vector.load %arg12[%17, %c0_17] : memref<64x512xf32, #tpu.memory_space<vmem>>, vector<8x512xf32>
    %cst_18 = arith.constant dense<0.000000e+00> : vector<8x512xf32>
    %19 = tpu.matmul %12, %11, %cst_18 {dimension_numbers = #tpu.dot_dimension_numbers<[1], [0], [0], [1], [0, 0, 1, 1], [], []>} : vector<8x128xf32>, vector<128x512xf32>, vector<8x512xf32> -> vector<8x512xf32>
    %20 = arith.addf %18, %19 : vector<8x512xf32>
    %21 = vector.extract_strided_slice %20 {offsets = [0, 0], sizes = [8, 128], strides = [1, 1]} : vector<8x512xf32> to vector<8x128xf32>
    %22 = arith.negf %21 : vector<8x128xf32>
    %23 = math.exp %22 : vector<8x128xf32>
    %cst_19 = arith.constant 1.000000e+00 : f32
    %24 = vector.broadcast %cst_19 : f32 to vector<8x128xf32>
    %25 = arith.addf %24, %23 : vector<8x128xf32>
    %26 = arith.divf %24, %25 : vector<8x128xf32>
    %27 = vector.extract_strided_slice %20 {offsets = [0, 128], sizes = [8, 128], strides = [1, 1]} : vector<8x512xf32> to vector<8x128xf32>
    %28 = arith.negf %27 : vector<8x128xf32>
    %29 = math.exp %28 : vector<8x128xf32>
    %cst_20 = arith.constant 1.000000e+00 : f32
    %30 = vector.broadcast %cst_20 : f32 to vector<8x128xf32>
    %31 = arith.addf %30, %29 : vector<8x128xf32>
    %32 = arith.divf %30, %31 : vector<8x128xf32>
    %33 = vector.extract_strided_slice %20 {offsets = [0, 256], sizes = [8, 128], strides = [1, 1]} : vector<8x512xf32> to vector<8x128xf32>
    %34 = math.tanh %33 : vector<8x128xf32>
    %35 = vector.extract_strided_slice %20 {offsets = [0, 384], sizes = [8, 128], strides = [1, 1]} : vector<8x512xf32> to vector<8x128xf32>
    %36 = arith.negf %35 : vector<8x128xf32>
    %37 = math.exp %36 : vector<8x128xf32>
    %cst_21 = arith.constant 1.000000e+00 : f32
    %38 = vector.broadcast %cst_21 : f32 to vector<8x128xf32>
    %39 = arith.addf %38, %37 : vector<8x128xf32>
    %40 = arith.divf %38, %39 : vector<8x128xf32>
    %41 = arith.mulf %26, %13 : vector<8x128xf32>
    %42 = arith.mulf %32, %34 : vector<8x128xf32>
    %43 = arith.addf %41, %42 : vector<8x128xf32>
    %44 = math.tanh %43 : vector<8x128xf32>
    %45 = arith.mulf %40, %44 : vector<8x128xf32>
    %c0_22 = arith.constant 0 : index
    %46 = arith.index_cast %16 : i32 to index
    %c0_23 = arith.constant 0 : index
    %47 = vector.load %arg8[%c0_22, %46, %c0_23] : memref<1x64x128xf32, #tpu.memory_space<vmem>>, vector<1x8x128xf32>
    %48 = vector.shape_cast %47 : vector<1x8x128xf32> to vector<8x128xf32>
    %49 = vector.shape_cast %45 : vector<8x128xf32> to vector<1x8x128xf32>
    tpu.vector_store %arg8[%c0_22, %46, %c0_23], %49 {strides = array<i32>} : memref<1x64x128xf32, #tpu.memory_space<vmem>>, vector<1x8x128xf32>,
    %c1_i32 = arith.constant 1 : i32
    %c8_i32_24 = arith.constant 8 : i32
    %50 = arith.muli %c1_i32, %c8_i32_24 : i32
    %51 = tpu.assume_multiple %50, 8 : i32
    %52 = arith.index_cast %51 : i32 to index
    %c0_25 = arith.constant 0 : index
    %53 = vector.load %arg12[%52, %c0_25] : memref<64x512xf32, #tpu.memory_space<vmem>>, vector<8x512xf32>
    %cst_26 = arith.constant dense<0.000000e+00> : vector<8x512xf32>
    %54 = tpu.matmul %45, %11, %cst_26 {dimension_numbers = #tpu.dot_dimension_numbers<[1], [0], [0], [1], [0, 0, 1, 1], [], []>} : vector<8x128xf32>, vector<128x512xf32>, vector<8x512xf32> -> vector<8x512xf32>
    %55 = arith.addf %53, %54 : vector<8x512xf32>
    %56 = vector.extract_strided_slice %55 {offsets = [0, 0], sizes = [8, 128], strides = [1, 1]} : vector<8x512xf32> to vector<8x128xf32>
    %57 = arith.negf %56 : vector<8x128xf32>
    %58 = math.exp %57 : vector<8x128xf32>
    %cst_27 = arith.constant 1.000000e+00 : f32
    %59 = vector.broadcast %cst_27 : f32 to vector<8x128xf32>
    %60 = arith.addf %59, %58 : vector<8x128xf32>
    %61 = arith.divf %59, %60 : vector<8x128xf32>
    %62 = vector.extract_strided_slice %55 {offsets = [0, 128], sizes = [8, 128], strides = [1, 1]} : vector<8x512xf32> to vector<8x128xf32>
    %63 = arith.negf %62 : vector<8x128xf32>
    %64 = math.exp %63 : vector<8x128xf32>
    %cst_28 = arith.constant 1.000000e+00 : f32
    %65 = vector.broadcast %cst_28 : f32 to vector<8x128xf32>
    %66 = arith.addf %65, %64 : vector<8x128xf32>
    %67 = arith.divf %65, %66 : vector<8x128xf32>
    %68 = vector.extract_strided_slice %55 {offsets = [0, 256], sizes = [8, 128], strides = [1, 1]} : vector<8x512xf32> to vector<8x128xf32>
    %69 = math.tanh %68 : vector<8x128xf32>
    %70 = vector.extract_strided_slice %55 {offsets = [0, 384], sizes = [8, 128], strides = [1, 1]} : vector<8x512xf32> to vector<8x128xf32>
    %71 = arith.negf %70 : vector<8x128xf32>
    %72 = math.exp %71 : vector<8x128xf32>
    %cst_29 = arith.constant 1.000000e+00 : f32
    %73 = vector.broadcast %cst_29 : f32 to vector<8x128xf32>
    %74 = arith.addf %73, %72 : vector<8x128xf32>
    %75 = arith.divf %73, %74 : vector<8x128xf32>
    %76 = arith.mulf %61, %43 : vector<8x128xf32>
    %77 = arith.mulf %67, %69 : vector<8x128xf32>
    %78 = arith.addf %76, %77 : vector<8x128xf32>
    %79 = math.tanh %78 : vector<8x128xf32>
    %80 = arith.mulf %75, %79 : vector<8x128xf32>
    %c0_30 = arith.constant 0 : index
    %81 = arith.index_cast %51 : i32 to index
    %c0_31 = arith.constant 0 : index
    %82 = vector.load %arg8[%c0_30, %81, %c0_31] : memref<1x64x128xf32, #tpu.memory_space<vmem>>, vector<1x8x128xf32>
    %83 = vector.shape_cast %82 : vector<1x8x128xf32> to vector<8x128xf32>
    %84 = vector.shape_cast %80 : vector<8x128xf32> to vector<1x8x128xf32>
    tpu.vector_store %arg8[%c0_30, %81, %c0_31], %84 {strides = array<i32>} : memref<1x64x128xf32, #tpu.memory_space<vmem>>, vector<1x8x128xf32>,
    %c2_i32 = arith.constant 2 : i32
    %c8_i32_32 = arith.constant 8 : i32
    %85 = arith.muli %c2_i32, %c8_i32_32 : i32
    %86 = tpu.assume_multiple %85, 8 : i32
    %87 = arith.index_cast %86 : i32 to index
    %c0_33 = arith.constant 0 : index
    %88 = vector.load %arg12[%87, %c0_33] : memref<64x512xf32, #tpu.memory_space<vmem>>, vector<8x512xf32>
    %cst_34 = arith.constant dense<0.000000e+00> : vector<8x512xf32>
    %89 = tpu.matmul %80, %11, %cst_34 {dimension_numbers = #tpu.dot_dimension_numbers<[1], [0], [0], [1], [0, 0, 1, 1], [], []>} : vector<8x128xf32>, vector<128x512xf32>, vector<8x512xf32> -> vector<8x512xf32>
    %90 = arith.addf %88, %89 : vector<8x512xf32>
    %91 = vector.extract_strided_slice %90 {offsets = [0, 0], sizes = [8, 128], strides = [1, 1]} : vector<8x512xf32> to vector<8x128xf32>
    %92 = arith.negf %91 : vector<8x128xf32>
    %93 = math.exp %92 : vector<8x128xf32>
    %cst_35 = arith.constant 1.000000e+00 : f32
    %94 = vector.broadcast %cst_35 : f32 to vector<8x128xf32>
    %95 = arith.addf %94, %93 : vector<8x128xf32>
    %96 = arith.divf %94, %95 : vector<8x128xf32>
    %97 = vector.extract_strided_slice %90 {offsets = [0, 128], sizes = [8, 128], strides = [1, 1]} : vector<8x512xf32> to vector<8x128xf32>
    %98 = arith.negf %97 : vector<8x128xf32>
    %99 = math.exp %98 : vector<8x128xf32>
    %cst_36 = arith.constant 1.000000e+00 : f32
    %100 = vector.broadcast %cst_36 : f32 to vector<8x128xf32>
    %101 = arith.addf %100, %99 : vector<8x128xf32>
    %102 = arith.divf %100, %101 : vector<8x128xf32>
    %103 = vector.extract_strided_slice %90 {offsets = [0, 256], sizes = [8, 128], strides = [1, 1]} : vector<8x512xf32> to vector<8x128xf32>
    %104 = math.tanh %103 : vector<8x128xf32>
    %105 = vector.extract_strided_slice %90 {offsets = [0, 384], sizes = [8, 128], strides = [1, 1]} : vector<8x512xf32> to vector<8x128xf32>
    %106 = arith.negf %105 : vector<8x128xf32>
    %107 = math.exp %106 : vector<8x128xf32>
    %cst_37 = arith.constant 1.000000e+00 : f32
    %108 = vector.broadcast %cst_37 : f32 to vector<8x128xf32>
    %109 = arith.addf %108, %107 : vector<8x128xf32>
    %110 = arith.divf %108, %109 : vector<8x128xf32>
    %111 = arith.mulf %96, %78 : vector<8x128xf32>
    %112 = arith.mulf %102, %104 : vector<8x128xf32>
    %113 = arith.addf %111, %112 : vector<8x128xf32>
    %114 = math.tanh %113 : vector<8x128xf32>
    %115 = arith.mulf %110, %114 : vector<8x128xf32>
    %c0_38 = arith.constant 0 : index
    %116 = arith.index_cast %86 : i32 to index
    %c0_39 = arith.constant 0 : index
    %117 = vector.load %arg8[%c0_38, %116, %c0_39] : memref<1x64x128xf32, #tpu.memory_space<vmem>>, vector<1x8x128xf32>
    %118 = vector.shape_cast %117 : vector<1x8x128xf32> to vector<8x128xf32>
    %119 = vector.shape_cast %115 : vector<8x128xf32> to vector<1x8x128xf32>
    tpu.vector_store %arg8[%c0_38, %116, %c0_39], %119 {strides = array<i32>} : memref<1x64x128xf32, #tpu.memory_space<vmem>>, vector<1x8x128xf32>,
    %c3_i32 = arith.constant 3 : i32
    %c8_i32_40 = arith.constant 8 : i32
    %120 = arith.muli %c3_i32, %c8_i32_40 : i32
    %121 = tpu.assume_multiple %120, 8 : i32
    %122 = arith.index_cast %121 : i32 to index
    %c0_41 = arith.constant 0 : index
    %123 = vector.load %arg12[%122, %c0_41] : memref<64x512xf32, #tpu.memory_space<vmem>>, vector<8x512xf32>
    %cst_42 = arith.constant dense<0.000000e+00> : vector<8x512xf32>
    %124 = tpu.matmul %115, %11, %cst_42 {dimension_numbers = #tpu.dot_dimension_numbers<[1], [0], [0], [1], [0, 0, 1, 1], [], []>} : vector<8x128xf32>, vector<128x512xf32>, vector<8x512xf32> -> vector<8x512xf32>
    %125 = arith.addf %123, %124 : vector<8x512xf32>
    %126 = vector.extract_strided_slice %125 {offsets = [0, 0], sizes = [8, 128], strides = [1, 1]} : vector<8x512xf32> to vector<8x128xf32>
    %127 = arith.negf %126 : vector<8x128xf32>
    %128 = math.exp %127 : vector<8x128xf32>
    %cst_43 = arith.constant 1.000000e+00 : f32
    %129 = vector.broadcast %cst_43 : f32 to vector<8x128xf32>
    %130 = arith.addf %129, %128 : vector<8x128xf32>
    %131 = arith.divf %129, %130 : vector<8x128xf32>
    %132 = vector.extract_strided_slice %125 {offsets = [0, 128], sizes = [8, 128], strides = [1, 1]} : vector<8x512xf32> to vector<8x128xf32>
    %133 = arith.negf %132 : vector<8x128xf32>
    %134 = math.exp %133 : vector<8x128xf32>
    %cst_44 = arith.constant 1.000000e+00 : f32
    %135 = vector.broadcast %cst_44 : f32 to vector<8x128xf32>
    %136 = arith.addf %135, %134 : vector<8x128xf32>
    %137 = arith.divf %135, %136 : vector<8x128xf32>
    %138 = vector.extract_strided_slice %125 {offsets = [0, 256], sizes = [8, 128], strides = [1, 1]} : vector<8x512xf32> to vector<8x128xf32>
    %139 = math.tanh %138 : vector<8x128xf32>
    %140 = vector.extract_strided_slice %125 {offsets = [0, 384], sizes = [8, 128], strides = [1, 1]} : vector<8x512xf32> to vector<8x128xf32>
    %141 = arith.negf %140 : vector<8x128xf32>
    %142 = math.exp %141 : vector<8x128xf32>
    %cst_45 = arith.constant 1.000000e+00 : f32
    %143 = vector.broadcast %cst_45 : f32 to vector<8x128xf32>
    %144 = arith.addf %143, %142 : vector<8x128xf32>
    %145 = arith.divf %143, %144 : vector<8x128xf32>
    %146 = arith.mulf %131, %113 : vector<8x128xf32>
    %147 = arith.mulf %137, %139 : vector<8x128xf32>
    %148 = arith.addf %146, %147 : vector<8x128xf32>
    %149 = math.tanh %148 : vector<8x128xf32>
    %150 = arith.mulf %145, %149 : vector<8x128xf32>
    %c0_46 = arith.constant 0 : index
    %151 = arith.index_cast %121 : i32 to index
    %c0_47 = arith.constant 0 : index
    %152 = vector.load %arg8[%c0_46, %151, %c0_47] : memref<1x64x128xf32, #tpu.memory_space<vmem>>, vector<1x8x128xf32>
    %153 = vector.shape_cast %152 : vector<1x8x128xf32> to vector<8x128xf32>
    %154 = vector.shape_cast %150 : vector<8x128xf32> to vector<1x8x128xf32>
    tpu.vector_store %arg8[%c0_46, %151, %c0_47], %154 {strides = array<i32>} : memref<1x64x128xf32, #tpu.memory_space<vmem>>, vector<1x8x128xf32>,
    %c4_i32 = arith.constant 4 : i32
    %c8_i32_48 = arith.constant 8 : i32
    %155 = arith.muli %c4_i32, %c8_i32_48 : i32
    %156 = tpu.assume_multiple %155, 8 : i32
    %157 = arith.index_cast %156 : i32 to index
    %c0_49 = arith.constant 0 : index
    %158 = vector.load %arg12[%157, %c0_49] : memref<64x512xf32, #tpu.memory_space<vmem>>, vector<8x512xf32>
    %cst_50 = arith.constant dense<0.000000e+00> : vector<8x512xf32>
    %159 = tpu.matmul %150, %11, %cst_50 {dimension_numbers = #tpu.dot_dimension_numbers<[1], [0], [0], [1], [0, 0, 1, 1], [], []>} : vector<8x128xf32>, vector<128x512xf32>, vector<8x512xf32> -> vector<8x512xf32>
    %160 = arith.addf %158, %159 : vector<8x512xf32>
    %161 = vector.extract_strided_slice %160 {offsets = [0, 0], sizes = [8, 128], strides = [1, 1]} : vector<8x512xf32> to vector<8x128xf32>
    %162 = arith.negf %161 : vector<8x128xf32>
    %163 = math.exp %162 : vector<8x128xf32>
    %cst_51 = arith.constant 1.000000e+00 : f32
    %164 = vector.broadcast %cst_51 : f32 to vector<8x128xf32>
    %165 = arith.addf %164, %163 : vector<8x128xf32>
    %166 = arith.divf %164, %165 : vector<8x128xf32>
    %167 = vector.extract_strided_slice %160 {offsets = [0, 128], sizes = [8, 128], strides = [1, 1]} : vector<8x512xf32> to vector<8x128xf32>
    %168 = arith.negf %167 : vector<8x128xf32>
    %169 = math.exp %168 : vector<8x128xf32>
    %cst_52 = arith.constant 1.000000e+00 : f32
    %170 = vector.broadcast %cst_52 : f32 to vector<8x128xf32>
    %171 = arith.addf %170, %169 : vector<8x128xf32>
    %172 = arith.divf %170, %171 : vector<8x128xf32>
    %173 = vector.extract_strided_slice %160 {offsets = [0, 256], sizes = [8, 128], strides = [1, 1]} : vector<8x512xf32> to vector<8x128xf32>
    %174 = math.tanh %173 : vector<8x128xf32>
    %175 = vector.extract_strided_slice %160 {offsets = [0, 384], sizes = [8, 128], strides = [1, 1]} : vector<8x512xf32> to vector<8x128xf32>
    %176 = arith.negf %175 : vector<8x128xf32>
    %177 = math.exp %176 : vector<8x128xf32>
    %cst_53 = arith.constant 1.000000e+00 : f32
    %178 = vector.broadcast %cst_53 : f32 to vector<8x128xf32>
    %179 = arith.addf %178, %177 : vector<8x128xf32>
    %180 = arith.divf %178, %179 : vector<8x128xf32>
    %181 = arith.mulf %166, %148 : vector<8x128xf32>
    %182 = arith.mulf %172, %174 : vector<8x128xf32>
    %183 = arith.addf %181, %182 : vector<8x128xf32>
    %184 = math.tanh %183 : vector<8x128xf32>
    %185 = arith.mulf %180, %184 : vector<8x128xf32>
    %c0_54 = arith.constant 0 : index
    %186 = arith.index_cast %156 : i32 to index
    %c0_55 = arith.constant 0 : index
    %187 = vector.load %arg8[%c0_54, %186, %c0_55] : memref<1x64x128xf32, #tpu.memory_space<vmem>>, vector<1x8x128xf32>
    %188 = vector.shape_cast %187 : vector<1x8x128xf32> to vector<8x128xf32>
    %189 = vector.shape_cast %185 : vector<8x128xf32> to vector<1x8x128xf32>
    tpu.vector_store %arg8[%c0_54, %186, %c0_55], %189 {strides = array<i32>} : memref<1x64x128xf32, #tpu.memory_space<vmem>>, vector<1x8x128xf32>,
    %c5_i32 = arith.constant 5 : i32
    %c8_i32_56 = arith.constant 8 : i32
    %190 = arith.muli %c5_i32, %c8_i32_56 : i32
    %191 = tpu.assume_multiple %190, 8 : i32
    %192 = arith.index_cast %191 : i32 to index
    %c0_57 = arith.constant 0 : index
    %193 = vector.load %arg12[%192, %c0_57] : memref<64x512xf32, #tpu.memory_space<vmem>>, vector<8x512xf32>
    %cst_58 = arith.constant dense<0.000000e+00> : vector<8x512xf32>
    %194 = tpu.matmul %185, %11, %cst_58 {dimension_numbers = #tpu.dot_dimension_numbers<[1], [0], [0], [1], [0, 0, 1, 1], [], []>} : vector<8x128xf32>, vector<128x512xf32>, vector<8x512xf32> -> vector<8x512xf32>
    %195 = arith.addf %193, %194 : vector<8x512xf32>
    %196 = vector.extract_strided_slice %195 {offsets = [0, 0], sizes = [8, 128], strides = [1, 1]} : vector<8x512xf32> to vector<8x128xf32>
    %197 = arith.negf %196 : vector<8x128xf32>
    %198 = math.exp %197 : vector<8x128xf32>
    %cst_59 = arith.constant 1.000000e+00 : f32
    %199 = vector.broadcast %cst_59 : f32 to vector<8x128xf32>
    %200 = arith.addf %199, %198 : vector<8x128xf32>
    %201 = arith.divf %199, %200 : vector<8x128xf32>
    %202 = vector.extract_strided_slice %195 {offsets = [0, 128], sizes = [8, 128], strides = [1, 1]} : vector<8x512xf32> to vector<8x128xf32>
    %203 = arith.negf %202 : vector<8x128xf32>
    %204 = math.exp %203 : vector<8x128xf32>
    %cst_60 = arith.constant 1.000000e+00 : f32
    %205 = vector.broadcast %cst_60 : f32 to vector<8x128xf32>
    %206 = arith.addf %205, %204 : vector<8x128xf32>
    %207 = arith.divf %205, %206 : vector<8x128xf32>
    %208 = vector.extract_strided_slice %195 {offsets = [0, 256], sizes = [8, 128], strides = [1, 1]} : vector<8x512xf32> to vector<8x128xf32>
    %209 = math.tanh %208 : vector<8x128xf32>
    %210 = vector.extract_strided_slice %195 {offsets = [0, 384], sizes = [8, 128], strides = [1, 1]} : vector<8x512xf32> to vector<8x128xf32>
    %211 = arith.negf %210 : vector<8x128xf32>
    %212 = math.exp %211 : vector<8x128xf32>
    %cst_61 = arith.constant 1.000000e+00 : f32
    %213 = vector.broadcast %cst_61 : f32 to vector<8x128xf32>
    %214 = arith.addf %213, %212 : vector<8x128xf32>
    %215 = arith.divf %213, %214 : vector<8x128xf32>
    %216 = arith.mulf %201, %183 : vector<8x128xf32>
    %217 = arith.mulf %207, %209 : vector<8x128xf32>
    %218 = arith.addf %216, %217 : vector<8x128xf32>
    %219 = math.tanh %218 : vector<8x128xf32>
    %220 = arith.mulf %215, %219 : vector<8x128xf32>
    %c0_62 = arith.constant 0 : index
    %221 = arith.index_cast %191 : i32 to index
    %c0_63 = arith.constant 0 : index
    %222 = vector.load %arg8[%c0_62, %221, %c0_63] : memref<1x64x128xf32, #tpu.memory_space<vmem>>, vector<1x8x128xf32>
    %223 = vector.shape_cast %222 : vector<1x8x128xf32> to vector<8x128xf32>
    %224 = vector.shape_cast %220 : vector<8x128xf32> to vector<1x8x128xf32>
    tpu.vector_store %arg8[%c0_62, %221, %c0_63], %224 {strides = array<i32>} : memref<1x64x128xf32, #tpu.memory_space<vmem>>, vector<1x8x128xf32>,
    %c6_i32 = arith.constant 6 : i32
    %c8_i32_64 = arith.constant 8 : i32
    %225 = arith.muli %c6_i32, %c8_i32_64 : i32
    %226 = tpu.assume_multiple %225, 8 : i32
    %227 = arith.index_cast %226 : i32 to index
    %c0_65 = arith.constant 0 : index
    %228 = vector.load %arg12[%227, %c0_65] : memref<64x512xf32, #tpu.memory_space<vmem>>, vector<8x512xf32>
    %cst_66 = arith.constant dense<0.000000e+00> : vector<8x512xf32>
    %229 = tpu.matmul %220, %11, %cst_66 {dimension_numbers = #tpu.dot_dimension_numbers<[1], [0], [0], [1], [0, 0, 1, 1], [], []>} : vector<8x128xf32>, vector<128x512xf32>, vector<8x512xf32> -> vector<8x512xf32>
    %230 = arith.addf %228, %229 : vector<8x512xf32>
    %231 = vector.extract_strided_slice %230 {offsets = [0, 0], sizes = [8, 128], strides = [1, 1]} : vector<8x512xf32> to vector<8x128xf32>
    %232 = arith.negf %231 : vector<8x128xf32>
    %233 = math.exp %232 : vector<8x128xf32>
    %cst_67 = arith.constant 1.000000e+00 : f32
    %234 = vector.broadcast %cst_67 : f32 to vector<8x128xf32>
    %235 = arith.addf %234, %233 : vector<8x128xf32>
    %236 = arith.divf %234, %235 : vector<8x128xf32>
    %237 = vector.extract_strided_slice %230 {offsets = [0, 128], sizes = [8, 128], strides = [1, 1]} : vector<8x512xf32> to vector<8x128xf32>
    %238 = arith.negf %237 : vector<8x128xf32>
    %239 = math.exp %238 : vector<8x128xf32>
    %cst_68 = arith.constant 1.000000e+00 : f32
    %240 = vector.broadcast %cst_68 : f32 to vector<8x128xf32>
    %241 = arith.addf %240, %239 : vector<8x128xf32>
    %242 = arith.divf %240, %241 : vector<8x128xf32>
    %243 = vector.extract_strided_slice %230 {offsets = [0, 256], sizes = [8, 128], strides = [1, 1]} : vector<8x512xf32> to vector<8x128xf32>
    %244 = math.tanh %243 : vector<8x128xf32>
    %245 = vector.extract_strided_slice %230 {offsets = [0, 384], sizes = [8, 128], strides = [1, 1]} : vector<8x512xf32> to vector<8x128xf32>
    %246 = arith.negf %245 : vector<8x128xf32>
    %247 = math.exp %246 : vector<8x128xf32>
    %cst_69 = arith.constant 1.000000e+00 : f32
    %248 = vector.broadcast %cst_69 : f32 to vector<8x128xf32>
    %249 = arith.addf %248, %247 : vector<8x128xf32>
    %250 = arith.divf %248, %249 : vector<8x128xf32>
    %251 = arith.mulf %236, %218 : vector<8x128xf32>
    %252 = arith.mulf %242, %244 : vector<8x128xf32>
    %253 = arith.addf %251, %252 : vector<8x128xf32>
    %254 = math.tanh %253 : vector<8x128xf32>
    %255 = arith.mulf %250, %254 : vector<8x128xf32>
    %c0_70 = arith.constant 0 : index
    %256 = arith.index_cast %226 : i32 to index
    %c0_71 = arith.constant 0 : index
    %257 = vector.load %arg8[%c0_70, %256, %c0_71] : memref<1x64x128xf32, #tpu.memory_space<vmem>>, vector<1x8x128xf32>
    %258 = vector.shape_cast %257 : vector<1x8x128xf32> to vector<8x128xf32>
    %259 = vector.shape_cast %255 : vector<8x128xf32> to vector<1x8x128xf32>
    tpu.vector_store %arg8[%c0_70, %256, %c0_71], %259 {strides = array<i32>} : memref<1x64x128xf32, #tpu.memory_space<vmem>>, vector<1x8x128xf32>,
    %c7_i32 = arith.constant 7 : i32
    %c8_i32_72 = arith.constant 8 : i32
    %260 = arith.muli %c7_i32, %c8_i32_72 : i32
    %261 = tpu.assume_multiple %260, 8 : i32
    %262 = arith.index_cast %261 : i32 to index
    %c0_73 = arith.constant 0 : index
    %263 = vector.load %arg12[%262, %c0_73] : memref<64x512xf32, #tpu.memory_space<vmem>>, vector<8x512xf32>
    %cst_74 = arith.constant dense<0.000000e+00> : vector<8x512xf32>
    %264 = tpu.matmul %255, %11, %cst_74 {dimension_numbers = #tpu.dot_dimension_numbers<[1], [0], [0], [1], [0, 0, 1, 1], [], []>} : vector<8x128xf32>, vector<128x512xf32>, vector<8x512xf32> -> vector<8x512xf32>
    %265 = arith.addf %263, %264 : vector<8x512xf32>
    %266 = vector.extract_strided_slice %265 {offsets = [0, 0], sizes = [8, 128], strides = [1, 1]} : vector<8x512xf32> to vector<8x128xf32>
    %267 = arith.negf %266 : vector<8x128xf32>
    %268 = math.exp %267 : vector<8x128xf32>
    %cst_75 = arith.constant 1.000000e+00 : f32
    %269 = vector.broadcast %cst_75 : f32 to vector<8x128xf32>
    %270 = arith.addf %269, %268 : vector<8x128xf32>
    %271 = arith.divf %269, %270 : vector<8x128xf32>
    %272 = vector.extract_strided_slice %265 {offsets = [0, 128], sizes = [8, 128], strides = [1, 1]} : vector<8x512xf32> to vector<8x128xf32>
    %273 = arith.negf %272 : vector<8x128xf32>
    %274 = math.exp %273 : vector<8x128xf32>
    %cst_76 = arith.constant 1.000000e+00 : f32
    %275 = vector.broadcast %cst_76 : f32 to vector<8x128xf32>
    %276 = arith.addf %275, %274 : vector<8x128xf32>
    %277 = arith.divf %275, %276 : vector<8x128xf32>
    %278 = vector.extract_strided_slice %265 {offsets = [0, 256], sizes = [8, 128], strides = [1, 1]} : vector<8x512xf32> to vector<8x128xf32>
    %279 = math.tanh %278 : vector<8x128xf32>
    %280 = vector.extract_strided_slice %265 {offsets = [0, 384], sizes = [8, 128], strides = [1, 1]} : vector<8x512xf32> to vector<8x128xf32>
    %281 = arith.negf %280 : vector<8x128xf32>
    %282 = math.exp %281 : vector<8x128xf32>
    %cst_77 = arith.constant 1.000000e+00 : f32
    %283 = vector.broadcast %cst_77 : f32 to vector<8x128xf32>
    %284 = arith.addf %283, %282 : vector<8x128xf32>
    %285 = arith.divf %283, %284 : vector<8x128xf32>
    %286 = arith.mulf %271, %253 : vector<8x128xf32>
    %287 = arith.mulf %277, %279 : vector<8x128xf32>
    %288 = arith.addf %286, %287 : vector<8x128xf32>
    %289 = math.tanh %288 : vector<8x128xf32>
    %290 = arith.mulf %285, %289 : vector<8x128xf32>
    %c0_78 = arith.constant 0 : index
    %291 = arith.index_cast %261 : i32 to index
    %c0_79 = arith.constant 0 : index
    %292 = vector.load %arg8[%c0_78, %291, %c0_79] : memref<1x64x128xf32, #tpu.memory_space<vmem>>, vector<1x8x128xf32>
    %293 = vector.shape_cast %292 : vector<1x8x128xf32> to vector<8x128xf32>
    %294 = vector.shape_cast %290 : vector<8x128xf32> to vector<1x8x128xf32>
    tpu.vector_store %arg8[%c0_78, %291, %c0_79], %294 {strides = array<i32>} : memref<1x64x128xf32, #tpu.memory_space<vmem>>, vector<1x8x128xf32>,
    %c8_i32_80 = arith.constant 8 : i32
    %c0_81 = arith.constant 0 : index
    %c0_82 = arith.constant 0 : index
    %295 = vector.load %arg10[%c0_81, %c0_82] : memref<8x128xf32, #tpu.memory_space<vmem>>, vector<8x128xf32>
    tpu.vector_store %arg10[%c0_81, %c0_82], %290 {strides = array<i32>} : memref<8x128xf32, #tpu.memory_space<vmem>>, vector<8x128xf32>,
    %c0_83 = arith.constant 0 : index
    %c0_84 = arith.constant 0 : index
    %296 = vector.load %arg11[%c0_83, %c0_84] : memref<8x128xf32, #tpu.memory_space<vmem>>, vector<8x128xf32>
    tpu.vector_store %arg11[%c0_83, %c0_84], %288 {strides = array<i32>} : memref<8x128xf32, #tpu.memory_space<vmem>>, vector<8x128xf32>,
    %297 = arith.extui %14 : i1 to i32
    %c0_i32_85 = arith.constant 0 : i32
    %298 = arith.cmpi ne, %297, %c0_i32_85 : i32
    scf.if %298 {
      %c0_86 = arith.constant 0 : index
      %c0_87 = arith.constant 0 : index
      %c0_88 = arith.constant 0 : index
      %299 = vector.load %arg9[%c0_86, %c0_87, %c0_88] : memref<1x8x128xf32, #tpu.memory_space<vmem>>, vector<1x8x128xf32>
      %300 = vector.shape_cast %299 : vector<1x8x128xf32> to vector<8x128xf32>
      %301 = vector.shape_cast %288 : vector<8x128xf32> to vector<1x8x128xf32>
      tpu.vector_store %arg9[%c0_86, %c0_87, %c0_88], %301 {strides = array<i32>} : memref<1x8x128xf32, #tpu.memory_space<vmem>>, vector<1x8x128xf32>,
    } else {
    }
    return
  }
  func.func @transform_0(%arg0: i32, %arg1: i32) -> (i32, i32, i32) {
    %c0_i32 = arith.constant 0 : i32
    %c0_i32_0 = arith.constant 0 : i32
    return %arg0, %arg1, %c0_i32 : i32, i32, i32
  }
  func.func @transform_1(%arg0: i32, %arg1: i32) -> (i32, i32, i32) {
    %c0_i32 = arith.constant 0 : i32
    %c0_i32_0 = arith.constant 0 : i32
    %c0_i32_1 = arith.constant 0 : i32
    return %arg0, %c0_i32, %c0_i32_0 : i32, i32, i32
  }
  func.func @transform_2(%arg0: i32, %arg1: i32) -> (i32, i32, i32) {
    %c0_i32 = arith.constant 0 : i32
    %c0_i32_0 = arith.constant 0 : i32
    %c0_i32_1 = arith.constant 0 : i32
    return %arg0, %c0_i32, %c0_i32_0 : i32, i32, i32
  }
  func.func @transform_3(%arg0: i32, %arg1: i32) -> (i32, i32) {
    %c0_i32 = arith.constant 0 : i32
    %c0_i32_0 = arith.constant 0 : i32
    %c0_i32_1 = arith.constant 0 : i32
    return %c0_i32, %c0_i32_0 : i32, i32
  }
  func.func @transform_4(%arg0: i32, %arg1: i32) -> (i32, i32) {
    %c0_i32 = arith.constant 0 : i32
    %c0_i32_0 = arith.constant 0 : i32
    %c0_i32_1 = arith.constant 0 : i32
    return %c0_i32, %c0_i32_0 : i32, i32
  }
  func.func @transform_5(%arg0: i32, %arg1: i32) -> (i32, i32) {
    %c0_i32 = arith.constant 0 : i32
    %c0_i32_0 = arith.constant 0 : i32
    %c0_i32_1 = arith.constant 0 : i32
    return %c0_i32, %c0_i32_0 : i32, i32
  }
  func.func @transform_6(%arg0: i32, %arg1: i32) -> (i32, i32, i32) {
    %c0_i32 = arith.constant 0 : i32
    %c0_i32_0 = arith.constant 0 : i32
    return %arg0, %arg1, %c0_i32 : i32, i32, i32
  }
  func.func @transform_7(%arg0: i32, %arg1: i32) -> (i32, i32, i32) {
    %c0_i32 = arith.constant 0 : i32
    %c0_i32_0 = arith.constant 0 : i32
    %c0_i32_1 = arith.constant 0 : i32
    return %arg0, %c0_i32, %c0_i32_0 : i32, i32, i32
  }
}

</mosaic_0001>

<bundles_post_ra>
// kernel: tpu_custom_call.1
= control target key start
LH: loop header
LB: loop body
LE: loop exit
PB: predicated region body
PF: predicated region fallthrough
CT: control target
= control target key end

     0   :  { %13 = vsyncpa [#allocation6], 0  ;;  %s3316_s0 = inlined_call_operand.vmem [shape: f32[1,64,16], index: 0, kind: input, shape index: {}]   ;;  %s3317_s1 = inlined_call_operand.vmem [shape: f32[1,8,128], index: 1, kind: input, shape index: {}]   ;;  %s3318_s2 = inlined_call_operand.vmem [shape: f32[1,8,128], index: 2, kind: input, shape index: {}]   ;;  %s3319_s3 = inlined_call_operand.vmem [shape: f32[16,512], index: 3, kind: input, shape index: {}]   ;;  %s3320_s4 = inlined_call_operand.hbm [shape: f32[128,512], index: 4, kind: input, shape index: {}]   ;;  %s3321_s5 = inlined_call_operand.vmem [shape: f32[1,512], index: 5, kind: input, shape index: {}]   ;;  %s3322_s6 = inlined_call_operand.hbm [shape: f32[1,64,128], index: 6, kind: output, shape index: {0}]   ;;  %s3323_s7 = inlined_call_operand.hbm [shape: f32[1,8,128], index: 7, kind: output, shape index: {1}]  }
   0x1   :  { %14 = vsyncpa [#allocation7], 0 }
   0x2   :  { %15 = vsyncpa [#allocation10], 0  ;;  %s2743_s24 = smov [#allocation5]   ;;  %s2671_s28 = scalar_lea.hbm %s3320_s4, 8192 }
   0x3   :  { %s29_s25 = sshll.u32 %s2743_s24, 4  ;;  %p2672_p0 = scmp.ne.s32.totalorder %s3320_s4, %s2671_s28  ;;  %s30_s25 = int_to_ptr.vmem [resolvable:$true] %s29_s25 }
   0x4   :  { %p2675_p1 = scmp.lt.u32.totalorder %s2671_s28, %s3320_s4 }
   0x6   :  { %p2677_p2 = pnand %p2675_p1, %p2672_p0 }
   0x8   :  { %2680 = shalt.err (!%p2677_p2)
}
   0x9   :  { %s2681_s10 = scalar_lea.vmem %s30_s25, 8192  ;;  %p2686_p4 = scmp.lt.s32.totalorder %s30_s25, %s30_s25 }
   0xa   :  { %p2682_p3 = scmp.ne.s32.totalorder %s30_s25, %s2681_s10  ;;  %p2687_p5 = scmp.lt.s32.totalorder %s2681_s10, %s2681_s10 }
   0xc   :  { %p2688_p6 = por %p2687_p5, %p2686_p4 }
   0xe   :  { %p2689_p7 = pnand %p2688_p6, %p2682_p3 }
  0x10   :  { %2692 = shalt.err (!%p2689_p7)
}
  0x11   :  { %s2744_s11 = smov 512   ;;  %s2745_s12 = smov 32  }
  0x12   :  { %35 = dma.hbm_to_vmem [thread:$0]  %s3320_s4, 8192, %s30_s25, [#allocation6], %s2744_s11, %s2744_s11, %s2745_s12  }
  0x13   :  { %2737 = dma.done.wait [#allocation6], 8192  }
  0x14   :  { %2738 = vsyncadd [#allocation6], 4294959104  ;;  %v2746_v0 = vmov 0.0   ;;  %v58_v1 = vld [vmem:[%s3319_s3 + $0x8] sm:$0xff]  ;;  %v60_v3 = vld [vmem:[%s3319_s3 + $0x18] sm:$0xff]  ;;  %vm87_vm0 = vcmask 130048  }
  0x15   :  { %176 = vmatprep.mubr.f32.mxu0 %v2746_v0  ;;  %289 = vmatprep.mubr.f32.mxu1 %v2746_v0  ;;  %v62_v2 = vld [vmem:[%s3319_s3 + $0x28] sm:$0xff]  ;;  %v64_v5 = vld [vmem:[%s3319_s3 + $0x38] sm:$0xff]  ;;  %v57_v6 = vld [vmem:[%s3319_s3] sm:$0xff] }
  0x16   :  { %v1951_v4 = vpack.c.bf16 %v62_v2, %v58_v1  ;;  %v61_v7 = vld [vmem:[%s3319_s3 + $0x20] sm:$0xff]  ;;  %v1955_v8 = vpack.c.bf16 %v64_v5, %v60_v3  ;;  %v59_v10 = vld [vmem:[%s3319_s3 + $0x10] sm:$0xff]  ;;  %v371_v14 = vld [vmem:[#allocation5 + $0x8] sm:$0xff] }
  0x17   :  { %v1953_v9 = vpack.c.bf16 %v61_v7, %v57_v6  ;;  %v63_v11 = vld [vmem:[%s3319_s3 + $0x30] sm:$0xff]  ;;  %v49_v12 = vld [vmem:[%s3316_s0] sm:$0xff]  ;;  %v375_v15 = vld [vmem:[#allocation5 + $0x28] sm:$0xff] }
  0x18   :  { %1952 = vmatprep.subr.bf16.mxu0 %v1951_v4  ;;  %v1957_v13 = vpack.c.bf16 %v63_v11, %v59_v10  ;;  %v373_v16 = vld [vmem:[#allocation5 + $0x18] sm:$0xff]  ;;  %1956 = vmatprep.subr.bf16.mxu1 %v1955_v8  ;;  %v2832_v17 = vpack.c.bf16 %v375_v15, %v371_v14  ;;  %v370_v19 = vld [vmem:[#allocation5] sm:$0xff]  ;;  %v372_v23 = vld [vmem:[#allocation5 + $0x10] sm:$0xff] }
  0x19   :  { %1954 = vmatpush1.bf16.msra.mxu0 %v1953_v9  ;;  %v377_v18 = vld [vmem:[#allocation5 + $0x38] sm:$0xff]  ;;  %v374_v20 = vld [vmem:[#allocation5 + $0x20] sm:$0xff]  ;;  %v376_v24 = vld [vmem:[#allocation5 + $0x30] sm:$0xff] }
  0x1a   :  { %1958 = vmatpush1.bf16.msra.mxu1 %v1957_v13  ;;  %v2834_v21 = vpack.c.bf16 %v377_v18, %v373_v16  ;;  %v2836_v22 = vpack.c.bf16 %v374_v20, %v370_v19  ;;  %1960 = vmatprep.subr.bf16.mxu0 %v2832_v17  ;;  %v2839_v25 = vpack.c.bf16 %v376_v24, %v372_v23  ;;  %v379_v26 = vld [vmem:[#allocation5 + $0x48] sm:$0xff]  ;;  %v381_v28 = vld [vmem:[#allocation5 + $0x58] sm:$0xff]  ;;  %v378_v31 = vld [vmem:[#allocation5 + $0x40] sm:$0xff] }
  0x1b   :  { %v383_v27 = vld [vmem:[#allocation5 + $0x68] sm:$0xff]  ;;  %v385_v30 = vld [vmem:[#allocation5 + $0x78] sm:$0xff]  ;;  %v382_v32 = vld [vmem:[#allocation5 + $0x60] sm:$0xff] }
  0x1c   :  { %1911 = vmatmul.mubr.msk.f32.vlgmr.msra.gmra.mrb[0].mxu0 %vm87_vm0, %v49_v12  ;;  %1992 = vmatprep.subr.bf16.mxu1 %v2834_v21  ;;  %v2843_v29 = vpack.c.bf16 %v383_v27, %v379_v26  ;;  %v50_v33 = vld [vmem:[%s3316_s0 + $0x8] sm:$0xff]  ;;  %v2850_v34 = vpack.c.bf16 %v385_v30, %v381_v28  ;;  %v2852_v35 = vpack.c.bf16 %v382_v32, %v378_v31  ;;  %v380_v36 = vld [vmem:[#allocation5 + $0x50] sm:$0xff]  ;;  %v389_v41 = vld [vmem:[#allocation5 + $0x98] sm:$0xff] }
  0x1d   :  { %1919 = vmatmul.mubr.msk.f32.vlgmr.msra.gmra.mrb[0].mxu1 %vm87_vm0, %v49_v12  ;;  %1962 = vmatpush1.bf16.msra.mxu0 %v2836_v22  ;;  %v384_v37 = vld [vmem:[#allocation5 + $0x70] sm:$0xff]  ;;  %v387_v39 = vld [vmem:[#allocation5 + $0x88] sm:$0xff]  ;;  %v393_v43 = vld [vmem:[#allocation5 + $0xb8] sm:$0xff] }
  0x1e   :  { %1994 = vmatpush1.bf16.msra.mxu1 %v2839_v25  ;;  %182 = vmatprep.mubr.f32.mxu0 %v2746_v0  ;;  %v2856_v38 = vpack.c.bf16 %v384_v37, %v380_v36  ;;  %v391_v40 = vld [vmem:[#allocation5 + $0xa8] sm:$0xff]  ;;  %v386_v44 = vld [vmem:[#allocation5 + $0x80] sm:$0xff]  ;;  %v51_v46 = vld [vmem:[%s3316_s0 + $0x10] sm:$0xff]  ;;  %v2867_v47 = vpack.c.bf16 %v393_v43, %v389_v41 }
  0x1f   :  { %295 = vmatprep.mubr.f32.mxu1 %v2746_v0  ;;  %1964 = vmatprep.subr.bf16.mxu0 %v2843_v29  ;;  %v2860_v42 = vpack.c.bf16 %v391_v40, %v387_v39  ;;  %v390_v45 = vld [vmem:[#allocation5 + $0xa0] sm:$0xff]  ;;  %v388_v48 = vld [vmem:[#allocation5 + $0x90] sm:$0xff]  ;;  %v395_v51 = vld [vmem:[#allocation5 + $0xc8] sm:$0xff] }
  0x20   :  { %1912 = vmatmul.mubr.msk.f32.gmra.mrb[2].mxu0 %vm87_vm0, %v50_v33  ;;  %1996 = vmatprep.subr.bf16.mxu1 %v2850_v34  ;;  %v392_v49 = vld [vmem:[#allocation5 + $0xb0] sm:$0xff]  ;;  %v2871_v50 = vpack.c.bf16 %v390_v45, %v386_v44  ;;  %v399_v52 = vld [vmem:[#allocation5 + $0xe8] sm:$0xff]  ;;  %v397_v53 = vld [vmem:[#allocation5 + $0xd8] sm:$0xff] }
  0x21   :  { %1920 = vmatmul.mubr.msk.f32.gmra.mrb[2].mxu1 %vm87_vm0, %v50_v33  ;;  %1966 = vmatpush1.bf16.msra.mxu0 %v2852_v35  ;;  %v2875_v54 = vpack.c.bf16 %v392_v49, %v388_v48  ;;  %v401_v55 = vld [vmem:[#allocation5 + $0xf8] sm:$0xff]  ;;  %v394_v56 = vld [vmem:[#allocation5 + $0xc0] sm:$0xff]  ;;  %v2879_v58 = vpack.c.bf16 %v399_v52, %v395_v51  ;;  %v396_v59 = vld [vmem:[#allocation5 + $0xd0] sm:$0xff] }
  0x22   :  { %1998 = vmatpush1.bf16.msra.mxu1 %v2856_v38  ;;  %188 = vmatprep.mubr.f32.mxu0 %v2746_v0  ;;  %v398_v57 = vld [vmem:[#allocation5 + $0xe0] sm:$0xff]  ;;  %v400_v60 = vld [vmem:[#allocation5 + $0xf0] sm:$0xff]  ;;  %v2883_v61 = vpack.c.bf16 %v401_v55, %v397_v53  ;;  %v403_v62 = vld [vmem:[#allocation5 + $0x108] sm:$0xff] }
  0x23   :  { %301 = vmatprep.mubr.f32.mxu1 %v2746_v0  ;;  %1968 = vmatprep.subr.bf16.mxu0 %v2860_v42  ;;  %v407_v63 = vld [vmem:[#allocation5 + $0x128] sm:$0xff]  ;;  %v52_v1 = vld [vmem:[%s3316_s0 + $0x18] sm:$0xff]  ;;  %v2890_v2 = vpack.c.bf16 %v398_v57, %v394_v56  ;;  %v2894_v5 = vpack.c.bf16 %v400_v60, %v396_v59  ;;  %v402_v6 = vld [vmem:[#allocation5 + $0x100] sm:$0xff] }
  0x24   :  { %1913 = vmatmul.mubr.msk.f32.gmra.mrb[4].mxu0 %vm87_vm0, %v51_v46  ;;  %2000 = vmatprep.subr.bf16.mxu1 %v2867_v47  ;;  %v405_v3 = vld [vmem:[#allocation5 + $0x118] sm:$0xff]  ;;  %v406_v7 = vld [vmem:[#allocation5 + $0x120] sm:$0xff]  ;;  %v2898_v8 = vpack.c.bf16 %v407_v63, %v403_v62  ;;  %v404_v9 = vld [vmem:[#allocation5 + $0x110] sm:$0xff] }
  0x25   :  { %1921 = vmatmul.mubr.msk.f32.gmra.mrb[4].mxu1 %vm87_vm0, %v51_v46  ;;  %1970 = vmatpush1.bf16.msra.mxu0 %v2871_v50  ;;  %v409_v4 = vld [vmem:[#allocation5 + $0x138] sm:$0xff]  ;;  %v408_v10 = vld [vmem:[#allocation5 + $0x130] sm:$0xff]  ;;  %v411_v12 = vld [vmem:[#allocation5 + $0x148] sm:$0xff]  ;;  %v2909_v15 = vpack.c.bf16 %v406_v7, %v402_v6 }
  0x26   :  { %2002 = vmatpush1.bf16.msra.mxu1 %v2875_v54  ;;  %194 = vmatprep.mubr.f32.mxu0 %v2746_v0  ;;  %v2902_v11 = vpack.c.bf16 %v409_v4, %v405_v3  ;;  %v415_v13 = vld [vmem:[#allocation5 + $0x168] sm:$0xff]  ;;  %v53_v14 = vld [vmem:[%s3316_s0 + $0x20] sm:$0xff]  ;;  %v413_v16 = vld [vmem:[#allocation5 + $0x158] sm:$0xff]  ;;  %v2913_v19 = vpack.c.bf16 %v408_v10, %v404_v9  ;;  %v67_v9 = vlaneseq }
  0x27   :  { %307 = vmatprep.mubr.f32.mxu1 %v2746_v0  ;;  %1972 = vmatprep.subr.bf16.mxu0 %v2879_v58  ;;  %v417_v18 = vld [vmem:[#allocation5 + $0x178] sm:$0xff]  ;;  %v410_v20 = vld [vmem:[#allocation5 + $0x140] sm:$0xff]  ;;  %v2917_v24 = vpack.c.bf16 %v415_v13, %v411_v12  ;;  %v412_v26 = vld [vmem:[#allocation5 + $0x150] sm:$0xff] }
  0x28   :  { %1914 = vmatmul.mubr.msk.f32.gmra.mrb[6].mxu0 %vm87_vm0, %v52_v1  ;;  %2004 = vmatprep.subr.bf16.mxu1 %v2883_v61  ;;  %v414_v23 = vld [vmem:[#allocation5 + $0x160] sm:$0xff]  ;;  %v416_v27 = vld [vmem:[#allocation5 + $0x170] sm:$0xff]  ;;  %v2921_v28 = vpack.c.bf16 %v417_v18, %v413_v16  ;;  %v419_v30 = vld [vmem:[#allocation5 + $0x188] sm:$0xff]  ;;  %v68_v10 = vshrl.u32 %v67_v9, 7 }
  0x29   :  { %1922 = vmatmul.mubr.msk.f32.gmra.mrb[6].mxu1 %vm87_vm0, %v52_v1  ;;  %1974 = vmatpush1.bf16.msra.mxu0 %v2890_v2  ;;  %v423_v31 = vld [vmem:[#allocation5 + $0x1a8] sm:$0xff]  ;;  %v2928_v33 = vpack.c.bf16 %v414_v23, %v410_v20  ;;  %v421_v36 = vld [vmem:[#allocation5 + $0x198] sm:$0xff]  ;;  %v2932_v39 = vpack.c.bf16 %v416_v27, %v412_v26  ;;  %v418_v40 = vld [vmem:[#allocation5 + $0x180] sm:$0xff] }
  0x2a   :  { %2006 = vmatpush1.bf16.msra.mxu1 %v2894_v5  ;;  %200 = vmatprep.mubr.f32.mxu0 %v2746_v0  ;;  %v54_v32 = vld [vmem:[%s3316_s0 + $0x28] sm:$0xff]  ;;  %v425_v37 = vld [vmem:[#allocation5 + $0x1b8] sm:$0xff]  ;;  %v422_v41 = vld [vmem:[#allocation5 + $0x1a0] sm:$0xff]  ;;  %v2936_v43 = vpack.c.bf16 %v423_v31, %v419_v30  ;;  %v69_v12 = vsub.s32 0, %v68_v10  ;;  %v81_v23 = vsub.s32 3, %v68_v10 }
  0x2b   :  { %313 = vmatprep.mubr.f32.mxu1 %v2746_v0  ;;  %1976 = vmatprep.subr.bf16.mxu0 %v2898_v8  ;;  %v420_v44 = vld [vmem:[#allocation5 + $0x190] sm:$0xff]  ;;  %v2940_v46 = vpack.c.bf16 %v425_v37, %v421_v36  ;;  %v427_v48 = vld [vmem:[#allocation5 + $0x1c8] sm:$0xff]  ;;  %v2947_v52 = vpack.c.bf16 %v422_v41, %v418_v40  ;;  %v429_v53 = vld [vmem:[#allocation5 + $0x1d8] sm:$0xff]  ;;  %v77_v41 = vsub.s32 2, %v68_v10 }
  0x2c   :  { %1915 = vmatmul.mubr.msk.f32.gmra.mrb[8].mxu0 %vm87_vm0, %v53_v14  ;;  %2008 = vmatprep.subr.bf16.mxu1 %v2902_v11  ;;  %v424_v45 = vld [vmem:[#allocation5 + $0x1b0] sm:$0xff]  ;;  %v431_v49 = vld [vmem:[#allocation5 + $0x1e8] sm:$0xff]  ;;  %v433_v55 = vld [vmem:[#allocation5 + $0x1f8] sm:$0xff] }
  0x2d   :  { %1923 = vmatmul.mubr.msk.f32.gmra.mrb[8].mxu1 %vm87_vm0, %v53_v14  ;;  %1978 = vmatpush1.bf16.msra.mxu0 %v2909_v15  ;;  %v55_v51 = vld [vmem:[%s3316_s0 + $0x30] sm:$0xff]  ;;  %v2951_v56 = vpack.c.bf16 %v424_v45, %v420_v44  ;;  %v426_v57 = vld [vmem:[#allocation5 + $0x1c0] sm:$0xff]  ;;  %v2955_v60 = vpack.c.bf16 %v431_v49, %v427_v48  ;;  %v2959_v1 = vpack.c.bf16 %v433_v55, %v429_v53  ;;  %v56_v3 = vld [vmem:[%s3316_s0 + $0x38] sm:$0xff]  ;;  %v73_v14 = vsub.s32 1, %v68_v10 }
  0x2e   :  { %2010 = vmatpush1.bf16.msra.mxu1 %v2913_v19  ;;  %206 = vmatprep.mubr.f32.mxu0 %v2746_v0  ;;  %v430_v59 = vld [vmem:[#allocation5 + $0x1e0] sm:$0xff]  ;;  %v428_v62 = vld [vmem:[#allocation5 + $0x1d0] sm:$0xff] }
  0x2f   :  { %319 = vmatprep.mubr.f32.mxu1 %v2746_v0  ;;  %1980 = vmatprep.subr.bf16.mxu0 %v2917_v24  ;;  %v432_v63 = vld [vmem:[#allocation5 + $0x1f0] sm:$0xff]  ;;  %v2966_v4 = vpack.c.bf16 %v430_v59, %v426_v57  ;;  %v45_v7 = vld [vmem:[%s3317_s1] sm:$0xff] }
  0x30   :  { %1916 = vmatmul.mubr.msk.f32.gmra.mrb[10].mxu0 %vm87_vm0, %v54_v32  ;;  %2012 = vmatprep.subr.bf16.mxu1 %v2921_v28  ;;  %v2970_v6 = vpack.c.bf16 %v432_v63, %v428_v62  ;;  %v65_v13 = vld [vmem:[%s3321_s5] sm:$0xf] }
  0x31   :  { %1924 = vmatmul.mubr.msk.f32.gmra.mrb[10].mxu1 %vm87_vm0, %v54_v32  ;;  %1982 = vmatpush1.bf16.msra.mxu0 %v2928_v33  ;;  %v3023_v16 = vrot.slane %v65_v13, %v69_v12  ;;  %v3025_v18 = vrot.slane %v65_v13, %v73_v14  ;;  %v3029_v40 = vrot.slane %v65_v13, %v81_v23  ;;  %v47_v62 = vld [vmem:[%s3318_s2] sm:$0xff]  ;;  %s2747_s2 = smov [#allocation9]  }
  0x32   :  { %2014 = vmatpush1.bf16.msra.mxu1 %v2932_v39  ;;  %212 = vmatprep.mubr.f32.mxu0 %v2746_v0  ;;  %v3032_v45 = vrot.slane %v65_v13, %v77_v41  ;;  %s1891_s24 = sshll.u32 %s2747_s2, 4  ;;  %s1892_s24 = int_to_ptr.vmem [resolvable:$true] %s1891_s24 }
  0x33   :  { %325 = vmatprep.mubr.f32.mxu1 %v2746_v0  ;;  %1984 = vmatprep.subr.bf16.mxu0 %v2936_v43  ;;  %s2693_s25 = scalar_lea.vmem %s1892_s24, 128  ;;  %p2698_p9 = scmp.lt.s32.totalorder %s1892_s24, %s1892_s24 }
  0x34   :  { %1917 = vmatmul.mubr.msk.f32.gmra.mrb[12].mxu0 %vm87_vm0, %v55_v51  ;;  %2016 = vmatprep.subr.bf16.mxu1 %v2940_v46  ;;  %p2694_p8 = scmp.ne.s32.totalorder %s1892_s24, %s2693_s25  ;;  %p2699_p10 = scmp.lt.s32.totalorder %s2693_s25, %s2693_s25 }
  0x35   :  { %1925 = vmatmul.mubr.msk.f32.gmra.mrb[12].mxu1 %vm87_vm0, %v55_v51  ;;  %1986 = vmatpush1.bf16.msra.mxu0 %v2947_v52 }
  0x36   :  { %2018 = vmatpush1.bf16.msra.mxu1 %v2951_v56  ;;  %218 = vmatprep.mubr.f32.mxu0 %v2746_v0  ;;  %p2700_p11 = por %p2699_p10, %p2698_p9 }
  0x37   :  { %331 = vmatprep.mubr.f32.mxu1 %v2746_v0  ;;  %1988 = vmatprep.subr.bf16.mxu0 %v2955_v60 }
  0x38   :  { %1918 = vmatmul.mubr.msk.f32.gmra.mrb[14].mxu0 %vm87_vm0, %v56_v3  ;;  %2020 = vmatprep.subr.bf16.mxu1 %v2959_v1  ;;  %p2701_p12 = pnand %p2700_p11, %p2694_p8 }
  0x39   :  { %1926 = vmatmul.mubr.msk.f32.gmra.mrb[14].mxu1 %vm87_vm0, %v56_v3  ;;  %1990 = vmatpush1.bf16.msra.mxu0 %v2966_v4 }
  0x3a   :  { %2022 = vmatpush1.bf16.msra.mxu1 %v2970_v6  ;;  %507 = vmatprep.mubr.f32.mxu0 %v2746_v0 }
  0x3b   :  { %578 = vmatprep.mubr.f32.mxu1 %v2746_v0  ;;  %2024 = vmatprep.subr.bf16.mxu0 %v2832_v17 }
  0x3c   :  { %508 = vmatmul.mubr.f32.vlgmr.msra.gmra.mrb[0].mxu0 %v45_v7  ;;  %2056 = vmatprep.subr.bf16.mxu1 %v2834_v21 }
  0x3d   :  { %579 = vmatmul.mubr.f32.vlgmr.msra.gmra.mrb[0].mxu1 %v45_v7  ;;  %2026 = vmatpush1.bf16.msra.mxu0 %v2836_v22 }
  0x3e   :  { %2058 = vmatpush1.bf16.msra.mxu1 %v2839_v25  ;;  %2028 = vmatprep.subr.bf16.mxu0 %v2843_v29 }
  0x3f   :  { %2060 = vmatprep.subr.bf16.mxu1 %v2850_v34  ;;  %685 = vmatprep.mubr.f32.mxu0 %v2746_v0 }
  0x40   :  { %756 = vmatprep.mubr.f32.mxu1 %v2746_v0 }
  0x41   :  { %2030 = vmatpush1.bf16.msra.mxu0 %v2852_v35 }
  0x42   :  { %2062 = vmatpush1.bf16.msra.mxu1 %v2856_v38  ;;  %2032 = vmatprep.subr.bf16.mxu0 %v2860_v42 }
  0x43   :  { %2064 = vmatprep.subr.bf16.mxu1 %v2867_v47 }
  0x45   :  { %2034 = vmatpush1.bf16.msra.mxu0 %v2871_v50 }
  0x46   :  { %2066 = vmatpush1.bf16.msra.mxu1 %v2875_v54  ;;  %2036 = vmatprep.subr.bf16.mxu0 %v2879_v58 }
  0x47   :  { %2068 = vmatprep.subr.bf16.mxu1 %v2883_v61 }
  0x49   :  { %2038 = vmatpush1.bf16.msra.mxu0 %v2890_v2 }
  0x4a   :  { %2070 = vmatpush1.bf16.msra.mxu1 %v2894_v5  ;;  %2040 = vmatprep.subr.bf16.mxu0 %v2898_v8 }
  0x4b   :  { %2072 = vmatprep.subr.bf16.mxu1 %v2902_v11 }
  0x4d   :  { %2042 = vmatpush1.bf16.msra.mxu0 %v2909_v15 }
  0x4e   :  { %2074 = vmatpush1.bf16.msra.mxu1 %v2913_v19  ;;  %2044 = vmatprep.subr.bf16.mxu0 %v2917_v24 }
  0x4f   :  { %2076 = vmatprep.subr.bf16.mxu1 %v2921_v28 }
  0x51   :  { %2046 = vmatpush1.bf16.msra.mxu0 %v2928_v33 }
  0x52   :  { %2078 = vmatpush1.bf16.msra.mxu1 %v2932_v39  ;;  %2048 = vmatprep.subr.bf16.mxu0 %v2936_v43 }
  0x53   :  { %2080 = vmatprep.subr.bf16.mxu1 %v2940_v46 }
  0x55   :  { %2050 = vmatpush1.bf16.msra.mxu0 %v2947_v52 }
  0x56   :  { %2082 = vmatpush1.bf16.msra.mxu1 %v2951_v56  ;;  %2052 = vmatprep.subr.bf16.mxu0 %v2955_v60 }
  0x57   :  { %2084 = vmatprep.subr.bf16.mxu1 %v2959_v1 }
  0x59   :  { %2054 = vmatpush1.bf16.msra.mxu0 %v2966_v4 }
  0x5a   :  { %2086 = vmatpush1.bf16.msra.mxu1 %v2970_v6  ;;  %2088 = vmatprep.subr.bf16.mxu0 %v2832_v17 }
  0x5b   :  { %2120 = vmatprep.subr.bf16.mxu1 %v2834_v21 }
 0x10f   :  { %v509_v20 = vpop.f32.mrb[0].mxu0 }
 0x110   :  { %v2471_v26 = vadd.f32 %v509_v20, %v3023_v16  ;;  %v580_v27 = vpop.f32.mrb[0].mxu1  ;;  %v511_v30 = vpop.f32.mrb[1].mxu0 }
 0x111   :  { %v2472_v31 = vadd.f32 %v511_v30, %v3025_v18  ;;  %v582_v32 = vpop.f32.mrb[1].mxu1  ;;  %v2487_v49 = vadd.f32 %v580_v27, %v3032_v45 }
 0x112   :  { %v1927_v36 = vmul.f32 -1.442695, %v2471_v26  ;;  %v2488_v44 = vadd.f32 %v582_v32, %v3029_v40 }
 0x113   :  { %v1928_v37 = vmul.f32 -1.442695, %v2472_v31 }
 0x114   :  { %2543 = vpow2.f32 %v1927_v36  ;;  %v1929_v48 = vmul.f32 -1.442695, %v2488_v44 }
 0x115   :  { %2545 = vpow2.f32 %v1928_v37 }
 0x116   :  { %2547 = vpow2.f32 %v1929_v48 }
 0x117   :  { %2549 = vtanh.f32 %v2487_v49 }
 0x11e   :  { %v2544_v51 = vpop.eup %2543 }
 0x11f   :  { %v2546_v53 = vpop.eup %2545  ;;  %v592_v55 = vadd.f32 1.0, %v2544_v51 }
 0x120   :  { %v598_v57 = vadd.f32 1.0, %v2546_v53  ;;  %v2548_v59 = vpop.eup %2547 }
 0x121   :  { %2551 = vrcp.f32 %v592_v55  ;;  %v2550_v63 = vpop.eup %2549  ;;  %v605_v10 = vadd.f32 1.0, %v2548_v59 }
 0x122   :  { %2553 = vrcp.f32 %v598_v57 }
 0x123   :  { %2555 = vrcp.f32 %v605_v10 }
 0x12b   :  { %v2552_v3 = vpop.eup %2551 }
 0x12c   :  { %v2554_v7 = vpop.eup %2553  ;;  %v608_v9 = vmul.f32 %v2552_v3, %v47_v62 }
 0x12d   :  { %v609_v12 = vmul.f32 %v2554_v7, %v2550_v63  ;;  %v2556_v14 = vpop.eup %2555 }
 0x12f   :  { %v3038_v13 = vadd.f32 %v609_v12, %v608_v9 }
 0x131   :  { %2557 = vtanh.f32 %v3038_v13 }
 0x13b   :  { %v2558_v20 = vpop.eup %2557 }
 0x13c   :  { %v612_v23 = vmul.f32 %v2558_v20, %v2556_v14 }
 0x13e   :  { %613 = vst [vmem:[#allocation8] sm:$0xff] %v612_v23  ;;  %686 = vmatmul.mubr.f32.vlgmr.msra.gmra.mrb[2].mxu0 %v612_v23  ;;  %757 = vmatmul.mubr.f32.vlgmr.msra.gmra.mrb[2].mxu1 %v612_v23 }
 0x13f   :  { %2090 = vmatpush1.bf16.msra.mxu0 %v2836_v22  ;;  %2122 = vmatpush1.bf16.msra.mxu1 %v2839_v25 }
 0x140   :  { %2092 = vmatprep.subr.bf16.mxu0 %v2843_v29  ;;  %2124 = vmatprep.subr.bf16.mxu1 %v2850_v34 }
 0x141   :  { %864 = vmatprep.mubr.f32.mxu0 %v2746_v0  ;;  %935 = vmatprep.mubr.f32.mxu1 %v2746_v0 }
 0x143   :  { %2094 = vmatpush1.bf16.msra.mxu0 %v2852_v35  ;;  %2126 = vmatpush1.bf16.msra.mxu1 %v2856_v38 }
 0x144   :  { %2096 = vmatprep.subr.bf16.mxu0 %v2860_v42  ;;  %2128 = vmatprep.subr.bf16.mxu1 %v2867_v47 }
 0x147   :  { %2098 = vmatpush1.bf16.msra.mxu0 %v2871_v50  ;;  %2130 = vmatpush1.bf16.msra.mxu1 %v2875_v54 }
 0x148   :  { %2100 = vmatprep.subr.bf16.mxu0 %v2879_v58  ;;  %2132 = vmatprep.subr.bf16.mxu1 %v2883_v61 }
 0x14b   :  { %2102 = vmatpush1.bf16.msra.mxu0 %v2890_v2  ;;  %2134 = vmatpush1.bf16.msra.mxu1 %v2894_v5 }
 0x14c   :  { %2104 = vmatprep.subr.bf16.mxu0 %v2898_v8  ;;  %2136 = vmatprep.subr.bf16.mxu1 %v2902_v11 }
 0x14f   :  { %2106 = vmatpush1.bf16.msra.mxu0 %v2909_v15  ;;  %2138 = vmatpush1.bf16.msra.mxu1 %v2913_v19 }
 0x150   :  { %2108 = vmatprep.subr.bf16.mxu0 %v2917_v24  ;;  %2140 = vmatprep.subr.bf16.mxu1 %v2921_v28 }
 0x153   :  { %2110 = vmatpush1.bf16.msra.mxu0 %v2928_v33  ;;  %2142 = vmatpush1.bf16.msra.mxu1 %v2932_v39 }
 0x154   :  { %2112 = vmatprep.subr.bf16.mxu0 %v2936_v43  ;;  %2144 = vmatprep.subr.bf16.mxu1 %v2940_v46 }
 0x157   :  { %2114 = vmatpush1.bf16.msra.mxu0 %v2947_v52  ;;  %2146 = vmatpush1.bf16.msra.mxu1 %v2951_v56 }
 0x158   :  { %2116 = vmatprep.subr.bf16.mxu0 %v2955_v60  ;;  %2148 = vmatprep.subr.bf16.mxu1 %v2959_v1 }
 0x15b   :  { %2118 = vmatpush1.bf16.msra.mxu0 %v2966_v4  ;;  %2150 = vmatpush1.bf16.msra.mxu1 %v2970_v6 }
 0x15c   :  { %2152 = vmatprep.subr.bf16.mxu0 %v2832_v17  ;;  %2184 = vmatprep.subr.bf16.mxu1 %v2834_v21 }
 0x211   :  { %v687_v26 = vpop.f32.mrb[2].mxu0  ;;  %v758_v27 = vpop.f32.mrb[2].mxu1 }
 0x212   :  { %v2473_v30 = vadd.f32 %v687_v26, %v3023_v16  ;;  %v689_v31 = vpop.f32.mrb[3].mxu0  ;;  %v760_v32 = vpop.f32.mrb[3].mxu1  ;;  %v2489_v49 = vadd.f32 %v758_v27, %v3032_v45 }
 0x213   :  { %v2474_v36 = vadd.f32 %v689_v31, %v3025_v18  ;;  %v2490_v44 = vadd.f32 %v760_v32, %v3029_v40 }
 0x214   :  { %v1930_v37 = vmul.f32 -1.442695, %v2473_v30 }
 0x215   :  { %v1931_v41 = vmul.f32 -1.442695, %v2474_v36  ;;  %v1932_v48 = vmul.f32 -1.442695, %v2490_v44 }
 0x216   :  { %2559 = vpow2.f32 %v1930_v37 }
 0x217   :  { %2561 = vpow2.f32 %v1931_v41 }
 0x218   :  { %2563 = vpow2.f32 %v1932_v48 }
 0x219   :  { %2565 = vtanh.f32 %v2489_v49 }
 0x220   :  { %v2560_v51 = vpop.eup %2559 }
 0x221   :  { %v2562_v53 = vpop.eup %2561  ;;  %v770_v55 = vadd.f32 1.0, %v2560_v51 }
 0x222   :  { %v776_v57 = vadd.f32 1.0, %v2562_v53  ;;  %v2564_v59 = vpop.eup %2563 }
 0x223   :  { %2567 = vrcp.f32 %v770_v55  ;;  %v2566_v62 = vpop.eup %2565  ;;  %v783_v9 = vadd.f32 1.0, %v2564_v59 }
 0x224   :  { %2569 = vrcp.f32 %v776_v57 }
 0x225   :  { %2571 = vrcp.f32 %v783_v9 }
 0x22d   :  { %v2568_v63 = vpop.eup %2567 }
 0x22e   :  { %v2570_v3 = vpop.eup %2569  ;;  %v786_v7 = vmul.f32 %v2568_v63, %v3038_v13 }
 0x22f   :  { %v787_v10 = vmul.f32 %v2570_v3, %v2566_v62  ;;  %v2572_v14 = vpop.eup %2571 }
 0x231   :  { %v3080_v12 = vadd.f32 %v787_v10, %v786_v7 }
 0x233   :  { %2573 = vtanh.f32 %v3080_v12 }
 0x23d   :  { %v2574_v20 = vpop.eup %2573 }
 0x23e   :  { %v790_v23 = vmul.f32 %v2574_v20, %v2572_v14 }
 0x240   :  { %792 = vst [vmem:[#allocation8 + $0x8] sm:$0xff] %v790_v23  ;;  %865 = vmatmul.mubr.f32.vlgmr.msra.gmra.mrb[4].mxu0 %v790_v23  ;;  %936 = vmatmul.mubr.f32.vlgmr.msra.gmra.mrb[4].mxu1 %v790_v23 }
 0x241   :  { %2154 = vmatpush1.bf16.msra.mxu0 %v2836_v22  ;;  %2186 = vmatpush1.bf16.msra.mxu1 %v2839_v25 }
 0x242   :  { %2156 = vmatprep.subr.bf16.mxu0 %v2843_v29  ;;  %2188 = vmatprep.subr.bf16.mxu1 %v2850_v34 }
 0x243   :  { %1043 = vmatprep.mubr.f32.mxu0 %v2746_v0  ;;  %1114 = vmatprep.mubr.f32.mxu1 %v2746_v0 }
 0x245   :  { %2158 = vmatpush1.bf16.msra.mxu0 %v2852_v35  ;;  %2190 = vmatpush1.bf16.msra.mxu1 %v2856_v38 }
 0x246   :  { %2160 = vmatprep.subr.bf16.mxu0 %v2860_v42  ;;  %2192 = vmatprep.subr.bf16.mxu1 %v2867_v47 }
 0x249   :  { %2162 = vmatpush1.bf16.msra.mxu0 %v2871_v50  ;;  %2194 = vmatpush1.bf16.msra.mxu1 %v2875_v54 }
 0x24a   :  { %2164 = vmatprep.subr.bf16.mxu0 %v2879_v58  ;;  %2196 = vmatprep.subr.bf16.mxu1 %v2883_v61 }
 0x24d   :  { %2166 = vmatpush1.bf16.msra.mxu0 %v2890_v2  ;;  %2198 = vmatpush1.bf16.msra.mxu1 %v2894_v5 }
 0x24e   :  { %2168 = vmatprep.subr.bf16.mxu0 %v2898_v8  ;;  %2200 = vmatprep.subr.bf16.mxu1 %v2902_v11 }
 0x251   :  { %2170 = vmatpush1.bf16.msra.mxu0 %v2909_v15  ;;  %2202 = vmatpush1.bf16.msra.mxu1 %v2913_v19 }
 0x252   :  { %2172 = vmatprep.subr.bf16.mxu0 %v2917_v24  ;;  %2204 = vmatprep.subr.bf16.mxu1 %v2921_v28 }
 0x255   :  { %2174 = vmatpush1.bf16.msra.mxu0 %v2928_v33  ;;  %2206 = vmatpush1.bf16.msra.mxu1 %v2932_v39 }
 0x256   :  { %2176 = vmatprep.subr.bf16.mxu0 %v2936_v43  ;;  %2208 = vmatprep.subr.bf16.mxu1 %v2940_v46 }
 0x259   :  { %2178 = vmatpush1.bf16.msra.mxu0 %v2947_v52  ;;  %2210 = vmatpush1.bf16.msra.mxu1 %v2951_v56 }
 0x25a   :  { %2180 = vmatprep.subr.bf16.mxu0 %v2955_v60  ;;  %2212 = vmatprep.subr.bf16.mxu1 %v2959_v1 }
 0x25d   :  { %2182 = vmatpush1.bf16.msra.mxu0 %v2966_v4  ;;  %2214 = vmatpush1.bf16.msra.mxu1 %v2970_v6 }
 0x25e   :  { %2216 = vmatprep.subr.bf16.mxu0 %v2832_v17  ;;  %2248 = vmatprep.subr.bf16.mxu1 %v2834_v21 }
 0x313   :  { %v866_v13 = vpop.f32.mrb[4].mxu0  ;;  %v937_v26 = vpop.f32.mrb[4].mxu1 }
 0x314   :  { %v2475_v27 = vadd.f32 %v866_v13, %v3023_v16  ;;  %v868_v30 = vpop.f32.mrb[5].mxu0  ;;  %v939_v31 = vpop.f32.mrb[5].mxu1  ;;  %v2491_v48 = vadd.f32 %v937_v26, %v3032_v45 }
 0x315   :  { %v2476_v32 = vadd.f32 %v868_v30, %v3025_v18  ;;  %v2492_v41 = vadd.f32 %v939_v31, %v3029_v40 }
 0x316   :  { %v1933_v36 = vmul.f32 -1.442695, %v2475_v27 }
 0x317   :  { %v1934_v37 = vmul.f32 -1.442695, %v2476_v32  ;;  %v1935_v44 = vmul.f32 -1.442695, %v2492_v41 }
 0x318   :  { %2575 = vpow2.f32 %v1933_v36 }
 0x319   :  { %2577 = vpow2.f32 %v1934_v37 }
 0x31a   :  { %2579 = vpow2.f32 %v1935_v44 }
 0x31b   :  { %2581 = vtanh.f32 %v2491_v48 }
 0x322   :  { %v2576_v49 = vpop.eup %2575 }
 0x323   :  { %v2578_v51 = vpop.eup %2577  ;;  %v949_v53 = vadd.f32 1.0, %v2576_v49 }
 0x324   :  { %v955_v55 = vadd.f32 1.0, %v2578_v51  ;;  %v2580_v57 = vpop.eup %2579 }
 0x325   :  { %2583 = vrcp.f32 %v949_v53  ;;  %v2582_v59 = vpop.eup %2581  ;;  %v962_v7 = vadd.f32 1.0, %v2580_v57 }
 0x326   :  { %2585 = vrcp.f32 %v955_v55 }
 0x327   :  { %2587 = vrcp.f32 %v962_v7 }
 0x32f   :  { %v2584_v62 = vpop.eup %2583 }
 0x330   :  { %v2586_v63 = vpop.eup %2585  ;;  %v965_v3 = vmul.f32 %v2584_v62, %v3080_v12 }
 0x331   :  { %v966_v9 = vmul.f32 %v2586_v63, %v2582_v59  ;;  %v2588_v14 = vpop.eup %2587 }
 0x333   :  { %v3122_v10 = vadd.f32 %v966_v9, %v965_v3 }
 0x335   :  { %2589 = vtanh.f32 %v3122_v10 }
 0x33f   :  { %v2590_v20 = vpop.eup %2589 }
 0x340   :  { %v969_v23 = vmul.f32 %v2590_v20, %v2588_v14 }
 0x342   :  { %971 = vst [vmem:[#allocation8 + $0x10] sm:$0xff] %v969_v23  ;;  %1044 = vmatmul.mubr.f32.vlgmr.msra.gmra.mrb[6].mxu0 %v969_v23  ;;  %1115 = vmatmul.mubr.f32.vlgmr.msra.gmra.mrb[6].mxu1 %v969_v23 }
 0x343   :  { %2218 = vmatpush1.bf16.msra.mxu0 %v2836_v22  ;;  %2250 = vmatpush1.bf16.msra.mxu1 %v2839_v25 }
 0x344   :  { %2220 = vmatprep.subr.bf16.mxu0 %v2843_v29  ;;  %2252 = vmatprep.subr.bf16.mxu1 %v2850_v34 }
 0x345   :  { %1222 = vmatprep.mubr.f32.mxu0 %v2746_v0  ;;  %1293 = vmatprep.mubr.f32.mxu1 %v2746_v0 }
 0x347   :  { %2222 = vmatpush1.bf16.msra.mxu0 %v2852_v35  ;;  %2254 = vmatpush1.bf16.msra.mxu1 %v2856_v38 }
 0x348   :  { %2224 = vmatprep.subr.bf16.mxu0 %v2860_v42  ;;  %2256 = vmatprep.subr.bf16.mxu1 %v2867_v47 }
 0x34b   :  { %2226 = vmatpush1.bf16.msra.mxu0 %v2871_v50  ;;  %2258 = vmatpush1.bf16.msra.mxu1 %v2875_v54 }
 0x34c   :  { %2228 = vmatprep.subr.bf16.mxu0 %v2879_v58  ;;  %2260 = vmatprep.subr.bf16.mxu1 %v2883_v61 }
 0x34f   :  { %2230 = vmatpush1.bf16.msra.mxu0 %v2890_v2  ;;  %2262 = vmatpush1.bf16.msra.mxu1 %v2894_v5 }
 0x350   :  { %2232 = vmatprep.subr.bf16.mxu0 %v2898_v8  ;;  %2264 = vmatprep.subr.bf16.mxu1 %v2902_v11 }
 0x353   :  { %2234 = vmatpush1.bf16.msra.mxu0 %v2909_v15  ;;  %2266 = vmatpush1.bf16.msra.mxu1 %v2913_v19 }
 0x354   :  { %2236 = vmatprep.subr.bf16.mxu0 %v2917_v24  ;;  %2268 = vmatprep.subr.bf16.mxu1 %v2921_v28 }
 0x357   :  { %2238 = vmatpush1.bf16.msra.mxu0 %v2928_v33  ;;  %2270 = vmatpush1.bf16.msra.mxu1 %v2932_v39 }
 0x358   :  { %2240 = vmatprep.subr.bf16.mxu0 %v2936_v43  ;;  %2272 = vmatprep.subr.bf16.mxu1 %v2940_v46 }
 0x35b   :  { %2242 = vmatpush1.bf16.msra.mxu0 %v2947_v52  ;;  %2274 = vmatpush1.bf16.msra.mxu1 %v2951_v56 }
 0x35c   :  { %2244 = vmatprep.subr.bf16.mxu0 %v2955_v60  ;;  %2276 = vmatprep.subr.bf16.mxu1 %v2959_v1 }
 0x35f   :  { %2246 = vmatpush1.bf16.msra.mxu0 %v2966_v4  ;;  %2278 = vmatpush1.bf16.msra.mxu1 %v2970_v6 }
 0x360   :  { %2280 = vmatprep.subr.bf16.mxu0 %v2832_v17  ;;  %2312 = vmatprep.subr.bf16.mxu1 %v2834_v21 }
 0x415   :  { %v1045_v12 = vpop.f32.mrb[6].mxu0  ;;  %v1116_v13 = vpop.f32.mrb[6].mxu1 }
 0x416   :  { %v2477_v26 = vadd.f32 %v1045_v12, %v3023_v16  ;;  %v1047_v27 = vpop.f32.mrb[7].mxu0  ;;  %v1118_v30 = vpop.f32.mrb[7].mxu1  ;;  %v2493_v44 = vadd.f32 %v1116_v13, %v3032_v45 }
 0x417   :  { %v2478_v31 = vadd.f32 %v1047_v27, %v3025_v18  ;;  %v2494_v37 = vadd.f32 %v1118_v30, %v3029_v40 }
 0x418   :  { %v1936_v32 = vmul.f32 -1.442695, %v2477_v26 }
 0x419   :  { %v1937_v36 = vmul.f32 -1.442695, %v2478_v31  ;;  %v1938_v41 = vmul.f32 -1.442695, %v2494_v37 }
 0x41a   :  { %2591 = vpow2.f32 %v1936_v32 }
 0x41b   :  { %2593 = vpow2.f32 %v1937_v36 }
 0x41c   :  { %2595 = vpow2.f32 %v1938_v41 }
 0x41d   :  { %2597 = vtanh.f32 %v2493_v44 }
 0x424   :  { %v2592_v48 = vpop.eup %2591 }
 0x425   :  { %v2594_v49 = vpop.eup %2593  ;;  %v1128_v51 = vadd.f32 1.0, %v2592_v48 }
 0x426   :  { %v1134_v53 = vadd.f32 1.0, %v2594_v49  ;;  %v2596_v55 = vpop.eup %2595 }
 0x427   :  { %2599 = vrcp.f32 %v1128_v51  ;;  %v2598_v57 = vpop.eup %2597  ;;  %v1141_v3 = vadd.f32 1.0, %v2596_v55 }
 0x428   :  { %2601 = vrcp.f32 %v1134_v53 }
 0x429   :  { %2603 = vrcp.f32 %v1141_v3 }
 0x431   :  { %v2600_v59 = vpop.eup %2599 }
 0x432   :  { %v2602_v62 = vpop.eup %2601  ;;  %v1144_v63 = vmul.f32 %v2600_v59, %v3122_v10 }
 0x433   :  { %v1145_v7 = vmul.f32 %v2602_v62, %v2598_v57  ;;  %v2604_v14 = vpop.eup %2603 }
 0x435   :  { %v3164_v9 = vadd.f32 %v1145_v7, %v1144_v63 }
 0x437   :  { %2605 = vtanh.f32 %v3164_v9 }
 0x441   :  { %v2606_v20 = vpop.eup %2605 }
 0x442   :  { %v1148_v23 = vmul.f32 %v2606_v20, %v2604_v14 }
 0x444   :  { %1150 = vst [vmem:[#allocation8 + $0x18] sm:$0xff] %v1148_v23  ;;  %1223 = vmatmul.mubr.f32.vlgmr.msra.gmra.mrb[8].mxu0 %v1148_v23  ;;  %1294 = vmatmul.mubr.f32.vlgmr.msra.gmra.mrb[8].mxu1 %v1148_v23 }
 0x445   :  { %2282 = vmatpush1.bf16.msra.mxu0 %v2836_v22  ;;  %2314 = vmatpush1.bf16.msra.mxu1 %v2839_v25 }
 0x446   :  { %2284 = vmatprep.subr.bf16.mxu0 %v2843_v29  ;;  %2316 = vmatprep.subr.bf16.mxu1 %v2850_v34 }
 0x447   :  { %1401 = vmatprep.mubr.f32.mxu0 %v2746_v0  ;;  %1472 = vmatprep.mubr.f32.mxu1 %v2746_v0 }
 0x449   :  { %2286 = vmatpush1.bf16.msra.mxu0 %v2852_v35  ;;  %2318 = vmatpush1.bf16.msra.mxu1 %v2856_v38 }
 0x44a   :  { %2288 = vmatprep.subr.bf16.mxu0 %v2860_v42  ;;  %2320 = vmatprep.subr.bf16.mxu1 %v2867_v47 }
 0x44d   :  { %2290 = vmatpush1.bf16.msra.mxu0 %v2871_v50  ;;  %2322 = vmatpush1.bf16.msra.mxu1 %v2875_v54 }
 0x44e   :  { %2292 = vmatprep.subr.bf16.mxu0 %v2879_v58  ;;  %2324 = vmatprep.subr.bf16.mxu1 %v2883_v61 }
 0x451   :  { %2294 = vmatpush1.bf16.msra.mxu0 %v2890_v2  ;;  %2326 = vmatpush1.bf16.msra.mxu1 %v2894_v5 }
 0x452   :  { %2296 = vmatprep.subr.bf16.mxu0 %v2898_v8  ;;  %2328 = vmatprep.subr.bf16.mxu1 %v2902_v11 }
 0x455   :  { %2298 = vmatpush1.bf16.msra.mxu0 %v2909_v15  ;;  %2330 = vmatpush1.bf16.msra.mxu1 %v2913_v19 }
 0x456   :  { %2300 = vmatprep.subr.bf16.mxu0 %v2917_v24  ;;  %2332 = vmatprep.subr.bf16.mxu1 %v2921_v28 }
 0x459   :  { %2302 = vmatpush1.bf16.msra.mxu0 %v2928_v33  ;;  %2334 = vmatpush1.bf16.msra.mxu1 %v2932_v39 }
 0x45a   :  { %2304 = vmatprep.subr.bf16.mxu0 %v2936_v43  ;;  %2336 = vmatprep.subr.bf16.mxu1 %v2940_v46 }
 0x45d   :  { %2306 = vmatpush1.bf16.msra.mxu0 %v2947_v52  ;;  %2338 = vmatpush1.bf16.msra.mxu1 %v2951_v56 }
 0x45e   :  { %2308 = vmatprep.subr.bf16.mxu0 %v2955_v60  ;;  %2340 = vmatprep.subr.bf16.mxu1 %v2959_v1 }
 0x461   :  { %2310 = vmatpush1.bf16.msra.mxu0 %v2966_v4  ;;  %2342 = vmatpush1.bf16.msra.mxu1 %v2970_v6 }
 0x462   :  { %2344 = vmatprep.subr.bf16.mxu0 %v2832_v17  ;;  %2376 = vmatprep.subr.bf16.mxu1 %v2834_v21 }
 0x517   :  { %v1224_v10 = vpop.f32.mrb[8].mxu0  ;;  %v1295_v12 = vpop.f32.mrb[8].mxu1 }
 0x518   :  { %v2479_v13 = vadd.f32 %v1224_v10, %v3023_v16  ;;  %v1226_v26 = vpop.f32.mrb[9].mxu0  ;;  %v1297_v27 = vpop.f32.mrb[9].mxu1  ;;  %v2495_v41 = vadd.f32 %v1295_v12, %v3032_v45 }
 0x519   :  { %v2480_v30 = vadd.f32 %v1226_v26, %v3025_v18  ;;  %v2496_v36 = vadd.f32 %v1297_v27, %v3029_v40 }
 0x51a   :  { %v1939_v31 = vmul.f32 -1.442695, %v2479_v13 }
 0x51b   :  { %v1940_v32 = vmul.f32 -1.442695, %v2480_v30  ;;  %v1941_v37 = vmul.f32 -1.442695, %v2496_v36 }
 0x51c   :  { %2607 = vpow2.f32 %v1939_v31 }
 0x51d   :  { %2609 = vpow2.f32 %v1940_v32 }
 0x51e   :  { %2611 = vpow2.f32 %v1941_v37 }
 0x51f   :  { %2613 = vtanh.f32 %v2495_v41 }
 0x526   :  { %v2608_v44 = vpop.eup %2607 }
 0x527   :  { %v2610_v48 = vpop.eup %2609  ;;  %v1307_v49 = vadd.f32 1.0, %v2608_v44 }
 0x528   :  { %v1313_v51 = vadd.f32 1.0, %v2610_v48  ;;  %v2612_v53 = vpop.eup %2611 }
 0x529   :  { %2615 = vrcp.f32 %v1307_v49  ;;  %v2614_v55 = vpop.eup %2613  ;;  %v1320_v63 = vadd.f32 1.0, %v2612_v53 }
 0x52a   :  { %2617 = vrcp.f32 %v1313_v51 }
 0x52b   :  { %2619 = vrcp.f32 %v1320_v63 }
 0x533   :  { %v2616_v57 = vpop.eup %2615 }
 0x534   :  { %v2618_v59 = vpop.eup %2617  ;;  %v1323_v62 = vmul.f32 %v2616_v57, %v3164_v9 }
 0x535   :  { %v1324_v3 = vmul.f32 %v2618_v59, %v2614_v55  ;;  %v2620_v14 = vpop.eup %2619 }
 0x537   :  { %v3206_v7 = vadd.f32 %v1324_v3, %v1323_v62 }
 0x539   :  { %2621 = vtanh.f32 %v3206_v7 }
 0x543   :  { %v2622_v20 = vpop.eup %2621 }
 0x544   :  { %v1327_v23 = vmul.f32 %v2622_v20, %v2620_v14 }
 0x546   :  { %1329 = vst [vmem:[#allocation8 + $0x20] sm:$0xff] %v1327_v23  ;;  %1402 = vmatmul.mubr.f32.vlgmr.msra.gmra.mrb[10].mxu0 %v1327_v23  ;;  %1473 = vmatmul.mubr.f32.vlgmr.msra.gmra.mrb[10].mxu1 %v1327_v23 }
 0x547   :  { %2346 = vmatpush1.bf16.msra.mxu0 %v2836_v22  ;;  %2378 = vmatpush1.bf16.msra.mxu1 %v2839_v25 }
 0x548   :  { %2348 = vmatprep.subr.bf16.mxu0 %v2843_v29  ;;  %2380 = vmatprep.subr.bf16.mxu1 %v2850_v34 }
 0x549   :  { %1580 = vmatprep.mubr.f32.mxu0 %v2746_v0  ;;  %1651 = vmatprep.mubr.f32.mxu1 %v2746_v0 }
 0x54b   :  { %2350 = vmatpush1.bf16.msra.mxu0 %v2852_v35  ;;  %2382 = vmatpush1.bf16.msra.mxu1 %v2856_v38 }
 0x54c   :  { %2352 = vmatprep.subr.bf16.mxu0 %v2860_v42  ;;  %2384 = vmatprep.subr.bf16.mxu1 %v2867_v47 }
 0x54f   :  { %2354 = vmatpush1.bf16.msra.mxu0 %v2871_v50  ;;  %2386 = vmatpush1.bf16.msra.mxu1 %v2875_v54 }
 0x550   :  { %2356 = vmatprep.subr.bf16.mxu0 %v2879_v58  ;;  %2388 = vmatprep.subr.bf16.mxu1 %v2883_v61 }
 0x553   :  { %2358 = vmatpush1.bf16.msra.mxu0 %v2890_v2  ;;  %2390 = vmatpush1.bf16.msra.mxu1 %v2894_v5 }
 0x554   :  { %2360 = vmatprep.subr.bf16.mxu0 %v2898_v8  ;;  %2392 = vmatprep.subr.bf16.mxu1 %v2902_v11 }
 0x557   :  { %2362 = vmatpush1.bf16.msra.mxu0 %v2909_v15  ;;  %2394 = vmatpush1.bf16.msra.mxu1 %v2913_v19 }
 0x558   :  { %2364 = vmatprep.subr.bf16.mxu0 %v2917_v24  ;;  %2396 = vmatprep.subr.bf16.mxu1 %v2921_v28 }
 0x55b   :  { %2366 = vmatpush1.bf16.msra.mxu0 %v2928_v33  ;;  %2398 = vmatpush1.bf16.msra.mxu1 %v2932_v39 }
 0x55c   :  { %2368 = vmatprep.subr.bf16.mxu0 %v2936_v43  ;;  %2400 = vmatprep.subr.bf16.mxu1 %v2940_v46 }
 0x55f   :  { %2370 = vmatpush1.bf16.msra.mxu0 %v2947_v52  ;;  %2402 = vmatpush1.bf16.msra.mxu1 %v2951_v56 }
 0x560   :  { %2372 = vmatprep.subr.bf16.mxu0 %v2955_v60  ;;  %2404 = vmatprep.subr.bf16.mxu1 %v2959_v1 }
 0x563   :  { %2374 = vmatpush1.bf16.msra.mxu0 %v2966_v4  ;;  %2406 = vmatpush1.bf16.msra.mxu1 %v2970_v6 }
 0x564   :  { %2408 = vmatprep.subr.bf16.mxu0 %v2832_v17  ;;  %2440 = vmatprep.subr.bf16.mxu1 %v2834_v21 }
 0x619   :  { %v1403_v9 = vpop.f32.mrb[10].mxu0  ;;  %v1474_v10 = vpop.f32.mrb[10].mxu1 }
 0x61a   :  { %v2481_v12 = vadd.f32 %v1403_v9, %v3023_v16  ;;  %v1405_v13 = vpop.f32.mrb[11].mxu0  ;;  %v1476_v26 = vpop.f32.mrb[11].mxu1  ;;  %v2497_v37 = vadd.f32 %v1474_v10, %v3032_v45 }
 0x61b   :  { %v2482_v27 = vadd.f32 %v1405_v13, %v3025_v18  ;;  %v2498_v32 = vadd.f32 %v1476_v26, %v3029_v40 }
 0x61c   :  { %v1942_v30 = vmul.f32 -1.442695, %v2481_v12 }
 0x61d   :  { %v1943_v31 = vmul.f32 -1.442695, %v2482_v27  ;;  %v1944_v36 = vmul.f32 -1.442695, %v2498_v32 }
 0x61e   :  { %2623 = vpow2.f32 %v1942_v30 }
 0x61f   :  { %2625 = vpow2.f32 %v1943_v31 }
 0x620   :  { %2627 = vpow2.f32 %v1944_v36 }
 0x621   :  { %2629 = vtanh.f32 %v2497_v37 }
 0x628   :  { %v2624_v17 = vpop.eup %2623 }
 0x629   :  { %v2626_v41 = vpop.eup %2625  ;;  %v1486_v21 = vadd.f32 1.0, %v2624_v17 }
 0x62a   :  { %v1492_v44 = vadd.f32 1.0, %v2626_v41  ;;  %v2628_v48 = vpop.eup %2627 }
 0x62b   :  { %2631 = vrcp.f32 %v1486_v21  ;;  %v2630_v49 = vpop.eup %2629  ;;  %v1499_v57 = vadd.f32 1.0, %v2628_v48 }
 0x62c   :  { %2633 = vrcp.f32 %v1492_v44 }
 0x62d   :  { %2635 = vrcp.f32 %v1499_v57 }
 0x635   :  { %v2632_v51 = vpop.eup %2631 }
 0x636   :  { %v2634_v53 = vpop.eup %2633  ;;  %v1502_v55 = vmul.f32 %v2632_v51, %v3206_v7 }
 0x637   :  { %v1503_v59 = vmul.f32 %v2634_v53, %v2630_v49  ;;  %v2636_v63 = vpop.eup %2635 }
 0x639   :  { %v3248_v62 = vadd.f32 %v1503_v59, %v1502_v55 }
 0x63b   :  { %2637 = vtanh.f32 %v3248_v62 }
 0x645   :  { %v2638_v3 = vpop.eup %2637 }
 0x646   :  { %v1506_v14 = vmul.f32 %v2638_v3, %v2636_v63 }
 0x648   :  { %1508 = vst [vmem:[#allocation8 + $0x28] sm:$0xff] %v1506_v14  ;;  %1581 = vmatmul.mubr.f32.vlgmr.msra.gmra.mrb[12].mxu0 %v1506_v14  ;;  %1652 = vmatmul.mubr.f32.vlgmr.msra.gmra.mrb[12].mxu1 %v1506_v14 }
 0x649   :  { %2410 = vmatpush1.bf16.msra.mxu0 %v2836_v22  ;;  %2442 = vmatpush1.bf16.msra.mxu1 %v2839_v25 }
 0x64a   :  { %2412 = vmatprep.subr.bf16.mxu0 %v2843_v29  ;;  %2444 = vmatprep.subr.bf16.mxu1 %v2850_v34 }
 0x64b   :  { %1759 = vmatprep.mubr.f32.mxu0 %v2746_v0  ;;  %1830 = vmatprep.mubr.f32.mxu1 %v2746_v0 }
 0x64d   :  { %2414 = vmatpush1.bf16.msra.mxu0 %v2852_v35  ;;  %2446 = vmatpush1.bf16.msra.mxu1 %v2856_v38 }
 0x64e   :  { %2416 = vmatprep.subr.bf16.mxu0 %v2860_v42  ;;  %2448 = vmatprep.subr.bf16.mxu1 %v2867_v47 }
 0x651   :  { %2418 = vmatpush1.bf16.msra.mxu0 %v2871_v50  ;;  %2450 = vmatpush1.bf16.msra.mxu1 %v2875_v54 }
 0x652   :  { %2420 = vmatprep.subr.bf16.mxu0 %v2879_v58  ;;  %2452 = vmatprep.subr.bf16.mxu1 %v2883_v61 }
 0x655   :  { %2422 = vmatpush1.bf16.msra.mxu0 %v2890_v2  ;;  %2454 = vmatpush1.bf16.msra.mxu1 %v2894_v5 }
 0x656   :  { %2424 = vmatprep.subr.bf16.mxu0 %v2898_v8  ;;  %2456 = vmatprep.subr.bf16.mxu1 %v2902_v11 }
 0x659   :  { %2426 = vmatpush1.bf16.msra.mxu0 %v2909_v15  ;;  %2458 = vmatpush1.bf16.msra.mxu1 %v2913_v19 }
 0x65a   :  { %2428 = vmatprep.subr.bf16.mxu0 %v2917_v24  ;;  %2460 = vmatprep.subr.bf16.mxu1 %v2921_v28 }
 0x65d   :  { %2430 = vmatpush1.bf16.msra.mxu0 %v2928_v33  ;;  %2462 = vmatpush1.bf16.msra.mxu1 %v2932_v39 }
 0x65e   :  { %2432 = vmatprep.subr.bf16.mxu0 %v2936_v43  ;;  %2464 = vmatprep.subr.bf16.mxu1 %v2940_v46 }
 0x661   :  { %2434 = vmatpush1.bf16.msra.mxu0 %v2947_v52  ;;  %2466 = vmatpush1.bf16.msra.mxu1 %v2951_v56 }
 0x662   :  { %2436 = vmatprep.subr.bf16.mxu0 %v2955_v60  ;;  %2468 = vmatprep.subr.bf16.mxu1 %v2959_v1 }
 0x665   :  { %2438 = vmatpush1.bf16.msra.mxu0 %v2966_v4  ;;  %2470 = vmatpush1.bf16.msra.mxu1 %v2970_v6 }
 0x71b   :  { %v1582_v0 = vpop.f32.mrb[12].mxu0  ;;  %v1653_v22 = vpop.f32.mrb[12].mxu1 }
 0x71c   :  { %v2483_v25 = vadd.f32 %v1582_v0, %v3023_v16  ;;  %v1584_v29 = vpop.f32.mrb[13].mxu0  ;;  %v1655_v34 = vpop.f32.mrb[13].mxu1  ;;  %v2499_v54 = vadd.f32 %v1653_v22, %v3032_v45 }
 0x71d   :  { %v2484_v35 = vadd.f32 %v1584_v29, %v3025_v18  ;;  %v2500_v47 = vadd.f32 %v1655_v34, %v3029_v40 }
 0x71e   :  { %v1945_v38 = vmul.f32 -1.442695, %v2483_v25 }
 0x71f   :  { %v1946_v42 = vmul.f32 -1.442695, %v2484_v35  ;;  %v1947_v50 = vmul.f32 -1.442695, %v2500_v47 }
 0x720   :  { %2639 = vpow2.f32 %v1945_v38 }
 0x721   :  { %2641 = vpow2.f32 %v1946_v42 }
 0x722   :  { %2643 = vpow2.f32 %v1947_v50 }
 0x723   :  { %2645 = vtanh.f32 %v2499_v54 }
 0x72a   :  { %v2640_v58 = vpop.eup %2639 }
 0x72b   :  { %v2642_v61 = vpop.eup %2641  ;;  %v1665_v2 = vadd.f32 1.0, %v2640_v58 }
 0x72c   :  { %v1671_v5 = vadd.f32 1.0, %v2642_v61  ;;  %v2644_v8 = vpop.eup %2643 }
 0x72d   :  { %2647 = vrcp.f32 %v1665_v2  ;;  %v2646_v11 = vpop.eup %2645  ;;  %v1678_v28 = vadd.f32 1.0, %v2644_v8 }
 0x72e   :  { %2649 = vrcp.f32 %v1671_v5 }
 0x72f   :  { %2651 = vrcp.f32 %v1678_v28 }
 0x737   :  { %v2648_v15 = vpop.eup %2647 }
 0x738   :  { %v2650_v19 = vpop.eup %2649  ;;  %v1681_v24 = vmul.f32 %v2648_v15, %v3248_v62 }
 0x739   :  { %v1682_v33 = vmul.f32 %v2650_v19, %v2646_v11  ;;  %v2652_v43 = vpop.eup %2651 }
 0x73b   :  { %v1683_v39 = vadd.f32 %v1682_v33, %v1681_v24 }
 0x73d   :  { %2653 = vtanh.f32 %v1683_v39 }
 0x747   :  { %v2654_v46 = vpop.eup %2653 }
 0x748   :  { %v1685_v52 = vmul.f32 %v2654_v46, %v2652_v43 }
 0x74a   :  { %1687 = vst [vmem:[#allocation8 + $0x30] sm:$0xff] %v1685_v52  ;;  %1760 = vmatmul.mubr.f32.vlgmr.msra.gmra.mrb[14].mxu0 %v1685_v52  ;;  %1831 = vmatmul.mubr.f32.vlgmr.msra.gmra.mrb[14].mxu1 %v1685_v52 }
 0x81d   :  { %v1761_v56 = vpop.f32.mrb[14].mxu0  ;;  %v1832_v60 = vpop.f32.mrb[14].mxu1 }
 0x81e   :  { %v2485_v1 = vadd.f32 %v1761_v56, %v3023_v16  ;;  %v1763_v4 = vpop.f32.mrb[15].mxu0  ;;  %v1834_v6 = vpop.f32.mrb[15].mxu1  ;;  %v2501_v12 = vadd.f32 %v1832_v60, %v3032_v45 }
 0x81f   :  { %v2486_v7 = vadd.f32 %v1763_v4, %v3025_v18  ;;  %v2502_v9 = vadd.f32 %v1834_v6, %v3029_v40 }
 0x820   :  { %v1948_v20 = vmul.f32 -1.442695, %v2485_v1 }
 0x821   :  { %v1949_v23 = vmul.f32 -1.442695, %v2486_v7  ;;  %v1950_v10 = vmul.f32 -1.442695, %v2502_v9 }
 0x822   :  { %2655 = vpow2.f32 %v1948_v20 }
 0x823   :  { %2657 = vpow2.f32 %v1949_v23 }
 0x824   :  { %2659 = vpow2.f32 %v1950_v10 }
 0x825   :  { %2661 = vtanh.f32 %v2501_v12 }
 0x82c   :  { %v2656_v13 = vpop.eup %2655 }
 0x82d   :  { %v2658_v26 = vpop.eup %2657  ;;  %v1844_v27 = vadd.f32 1.0, %v2656_v13 }
 0x82e   :  { %v1850_v30 = vadd.f32 1.0, %v2658_v26  ;;  %v2660_v16 = vpop.eup %2659 }
 0x82f   :  { %2663 = vrcp.f32 %v1844_v27  ;;  %v2662_v31 = vpop.eup %2661  ;;  %v1857_v37 = vadd.f32 1.0, %v2660_v16 }
 0x830   :  { %2665 = vrcp.f32 %v1850_v30 }
 0x831   :  { %2667 = vrcp.f32 %v1857_v37 }
 0x839   :  { %v2664_v18 = vpop.eup %2663 }
 0x83a   :  { %v2666_v32 = vpop.eup %2665  ;;  %v1860_v36 = vmul.f32 %v2664_v18, %v1683_v39 }
 0x83b   :  { %v1861_v40 = vmul.f32 %v2666_v32, %v2662_v31 }
 0x83d   :  { %v1862_v17 = vadd.f32 %v1861_v40, %v1860_v36 }
 0x83f   :  { %2669 = vtanh.f32 %v1862_v17  ;;  %1872 = vst [vmem:[#allocation9] sm:$0xff] %v1862_v17 }
 0x840   :  { %2704 = shalt.err (!%p2701_p12)
}
 0x841   :  { %s2705_s28 = scalar_lea.hbm %s3323_s7, 128 }
 0x842   :  { %p2706_p13 = scmp.ne.s32.totalorder %s3323_s7, %s2705_s28  ;;  %p2709_p0 = scmp.lt.u32.totalorder %s2705_s28, %s3323_s7 }
 0x844   :  { %p2711_p1 = pnand %p2709_p0, %p2706_p13 }
 0x846   :  { %2714 = shalt.err (!%p2711_p1)
}
 0x847   :  { %1894 = dma.vmem_to_hbm [thread:$0]  %s1892_s24, 128, %s3323_s7, [#allocation10]   ;;  %v2668_v45 = vpop.eup %2667 }
 0x848   :  { %s2748_s11 = smov [#allocation8]  }
 0x849   :  { %s1878_s12 = sshll.u32 %s2748_s11, 4  ;;  %v2670_v41 = vpop.eup %2669  ;;  %s1879_s12 = int_to_ptr.vmem [resolvable:$true] %s1878_s12 }
 0x84a   :  { %v1864_v21 = vmul.f32 %v2670_v41, %v2668_v45  ;;  %s2715_s13 = scalar_lea.vmem %s1879_s12, 1024  ;;  %p2720_p3 = scmp.lt.s32.totalorder %s1879_s12, %s1879_s12 }
 0x84b   :  { %p2716_p2 = scmp.ne.s32.totalorder %s1879_s12, %s2715_s13  ;;  %p2721_p4 = scmp.lt.s32.totalorder %s2715_s13, %s2715_s13 }
 0x84c   :  { %1866 = vst [vmem:[#allocation8 + $0x38] sm:$0xff] %v1864_v21 }
 0x84d   :  { %p2722_p5 = por %p2721_p4, %p2720_p3 }
 0x84f   :  { %p2723_p6 = pnand %p2722_p5, %p2716_p2 }
 0x851   :  { %2726 = shalt.err (!%p2723_p6)
}
 0x852   :  { %s2727_s16 = scalar_lea.hbm %s3322_s6, 1024 }
 0x853   :  { %p2728_p7 = scmp.ne.s32.totalorder %s3322_s6, %s2727_s16  ;;  %p2731_p8 = scmp.lt.u32.totalorder %s2727_s16, %s3322_s6 }
 0x855   :  { %p2733_p9 = pnand %p2731_p8, %p2728_p7 }
 0x857   :  { %2736 = shalt.err (!%p2733_p9)
}
 0x858   :  { %s2749_s20 = smov 128   ;;  %s2750_s4 = smov 8  }
 0x859   :  { %1884 = dma.vmem_to_hbm [thread:$0]  %s1879_s12, 1024, %s3322_s6, [#allocation7], %s2749_s20, %s2749_s20, %s2750_s4  }
 0x85a   :  { %2739 = dma.done.wait [#allocation7], 1024  }
 0x85b   :  { %2740 = vsyncadd [#allocation7], 4294966272 }
 0x85c   :  { %2741 = dma.done.wait [#allocation10], 128  }
 0x85d   :  { %2742 = vsyncadd [#allocation10], 4294967168 }
 0x85e   :  { %1901 = vsyncpa [#allocation6], 1 }
 0x85f   :  { %1902 = vsyncpa [#allocation7], 1 }
 0x860   :  { %1903 = vsyncpa [#allocation10], 1 }

</bundles_post_ra>
